<compile_context>
chip_gen: v5e
topology: v5e:2x2
jax: 0.10.0
libtpu: 0.0.40
codegen_flags: <defaults>
</compile_context>

<pallas_src>
import math

import numpy as np
import jax
import jax.numpy as jnp
from jax import lax
from jax.experimental import pallas as pl
from jax.experimental.pallas import tpu as pltpu

TILE_N = 512  # POI rows per grid step (multiple of 128; 512+ ~ HBM roofline)


def _poi2region_kernel(x_ref, zone_ref, q_ref, wsv_ref, bsv_ref,
                       wo_ref, bo_ref, hmask_ref, adj_ref, wg_ref,
                       bg_ref, alpha_ref, out_ref, m_sc, l_sc, num_sc):
    f32 = jnp.float32
    bf16 = jnp.bfloat16

    n = pl.program_id(0)
    last = pl.num_programs(0) - 1

    H = hmask_ref.shape[0]
    R = out_ref.shape[0]

    @pl.when(n == 0)
    def _init():
        m_sc[...] = jnp.full_like(m_sc, -1e30)
        l_sc[...] = jnp.zeros_like(l_sc)
        num_sc[...] = jnp.zeros_like(num_sc)

    hmask = hmask_ref[...]                                          # (H, D) f32 0/1
    hmask_b = hmask.astype(bf16)

    # --- fused (pre-scaled) score + value projection: one MXU matmul ---------
    sv = jnp.dot(x_ref[...], wsv_ref[...],
                 preferred_element_type=f32) + bsv_ref[...]         # (TN, H+D)
    s_t = sv[:, :H]                                                 # (TN, H) scores
    v_t = sv[:, H:]                                                 # (TN, D) values

    # --- online softmax state update (per-head running max; ratio-exact) -----
    m_prev = m_sc[...]                                              # (1, H)
    m_new = jnp.maximum(m_prev, jnp.max(s_t, axis=0, keepdims=True))
    corr = jnp.exp(m_prev - m_new)                                  # (1, H)
    e_t = jnp.exp(s_t - m_new).astype(bf16)                         # (TN, H)

    # region-membership mask for this tile; (R,1) iota broadcast vs (1,TN) zone
    zone_t = zone_ref[...]                                          # (1, TN) int32
    rid = lax.broadcasted_iota(jnp.int32, (R, 1), 0)
    memberb = (rid == zone_t).astype(bf16)                          # (R, TN)

    # denominator:  l[r, h] += sum_i member[r,i] * e[i,h]   (bf16 MXU, f32 acc)
    l_sc[...] = l_sc[...] * corr + jnp.dot(memberb, e_t,
                                           preferred_element_type=f32)

    # numerator:    num[r, d] += sum_i member[r,i] * e[i, head(d)] * V[i, d]
    e_cols = jnp.dot(e_t, hmask_b, preferred_element_type=f32)      # (TN, D)
    ve = (v_t * e_cols).astype(bf16)
    contrib = jnp.dot(memberb, ve, preferred_element_type=f32)      # (R, D)
    num_corr = jnp.dot(corr, hmask, preferred_element_type=f32)     # (1, D)
    num_sc[...] = num_sc[...] * num_corr + contrib
    m_sc[...] = m_new

    # --- finalize on the last POI tile ---------------------------------------
    @pl.when(n == last)
    def _finalize():
        # safe denominator: an empty region has an all-zero num row, so its
        # attention output is 0 and the embedding is q + relu(fc_o(q)).
        inv_l = pl.reciprocal(jnp.maximum(l_sc[...], 1e-30), approx=True)   # (R, H)
        att = num_sc[...] * jnp.dot(inv_l, hmask, preferred_element_type=f32)
        o = att + q_ref[...]                                        # seed residual
        o = o + jnp.maximum(
            jnp.dot(o.astype(bf16), wo_ref[...],
                    preferred_element_type=f32) + bo_ref[...], 0.0)
        # GCNConv: A_norm @ (O @ Wg^T) + bias
        g = jnp.dot(adj_ref[...],
                    jnp.dot(o.astype(bf16), wg_ref[...],
                            preferred_element_type=f32),
                    preferred_element_type=f32) + bg_ref[...]
        # PReLU (per-channel alpha)
        alpha = alpha_ref[...]
        out_ref[...] = jnp.where(g > 0, g, alpha * g)


def _build_head_mask(num_heads, d):
    dh = d // num_heads
    rows = jnp.arange(num_heads, dtype=jnp.int32)[:, None]
    cols = jnp.arange(d, dtype=jnp.int32)[None, :]
    return (cols // dh == rows).astype(jnp.float32)                 # (H, D)


def prepare_params(params, num_heads):
    """One-time host-side prep: fold the score projection, fuse weights, bf16."""
    bf16 = jnp.bfloat16
    f32 = jnp.float32
    D = params['Wq'].shape[0]
    inv_sqrt_d = 1.0 / math.sqrt(D)

    hmask = _build_head_mask(num_heads, D)                          # (H, D)
    q = (params['S'] @ params['Wq'].T + params['bq']).astype(f32)   # (1, D)
    qheads = hmask * q                                              # (H, D)
    # scores: (x @ Wk^T + bk) @ qheads^T / sqrt(D)  ==  x @ Ws + bs
    ws = (params['Wk'].T @ qheads.T) * inv_sqrt_d                   # (D, H)
    bs = (params['bk'] @ qheads.T) * inv_sqrt_d                     # (1, H)

    return dict(
        q=q,
        Wsv=jnp.concatenate([ws, params['Wv'].T], axis=1).astype(bf16),   # (D, H+D)
        bsv=jnp.concatenate([bs, params['bv']], axis=1).astype(f32),      # (1, H+D)
        Wo_t=params['Wo'].T.astype(bf16),
        bo=params['bo'].astype(f32),
        Wg_t=params['Wg'].T.astype(bf16),
        bg=params['bg'].astype(f32),
        alpha=params['alpha'].astype(f32),
        hmask=hmask,
    )


@jax.jit
def poi2region_forward(x, zone, adj_norm, prep):
    N, D = x.shape
    R = adj_norm.shape[0]
    H = prep['hmask'].shape[0]
    n_tiles = -(-N // TILE_N)
    n_pad = n_tiles * TILE_N

    # pad POIs to a multiple of TILE_N; padded rows get zone=R -> never members
    x_pad = jnp.zeros((n_pad, D), jnp.bfloat16).at[:N, :].set(x.astype(jnp.bfloat16))
    zone_pad = jnp.full((1, n_pad), R, jnp.int32).at[0, :N].set(zone.astype(jnp.int32))

    args = (x_pad, zone_pad, prep['q'], prep['Wsv'], prep['bsv'],
            prep['Wo_t'], prep['bo'], prep['hmask'],
            adj_norm.astype(jnp.float32), prep['Wg_t'], prep['bg'], prep['alpha'])

    in_specs = [
        pl.BlockSpec((TILE_N, D), lambda n: (n, 0)),       # x: tiled over POIs
        pl.BlockSpec((1, TILE_N), lambda n: (0, n)),       # zone: tiled over POIs
    ]
    in_specs += [pl.BlockSpec(a.shape, lambda n: (0, 0)) for a in args[2:]]
    out_spec = pl.BlockSpec((R, D), lambda n: (0, 0))      # resident accumulator

    flops = (2 * n_pad * D * (H + D)            # fused score + value projection
             + 2 * n_pad * H * D                # per-column e expansion
             + 2 * R * n_pad * (H + D)          # denominator + numerator
             + 4 * R * D * D + 2 * R * R * D)   # fc_o, GCN linear, adjacency
    bytes_accessed = (x_pad.size * 2 + zone_pad.size * 4
                      + sum(int(np.prod(a.shape)) * a.dtype.itemsize for a in args[2:])
                      + R * D * 4)
    cost = pl.CostEstimate(flops=int(flops), transcendentals=int(n_pad * H),
                           bytes_accessed=int(bytes_accessed))

    return pl.pallas_call(
        _poi2region_kernel,
        out_shape=jax.ShapeDtypeStruct((R, D), jnp.float32),
        grid_spec=pltpu.PrefetchScalarGridSpec(
            num_scalar_prefetch=0,
            grid=(n_tiles,),
            in_specs=in_specs,
            out_specs=out_spec,
            scratch_shapes=[pltpu.VMEM((1, H), jnp.float32),   # running per-head max
                            pltpu.VMEM((R, H), jnp.float32),   # softmax denominators
                            pltpu.VMEM((R, D), jnp.float32)]), # numerator accumulator
        compiler_params=pltpu.CompilerParams(
            dimension_semantics=("arbitrary",),
            vmem_limit_bytes=32 * 1024 * 1024),
        cost_estimate=cost,
    )(*args)


def init_params(key, D):
    keys = jax.random.split(key, 10)
    s = 1.0 / math.sqrt(D)

    def w(k):
        return jax.random.normal(k, (D, D), jnp.float32) * s

    def b(k):
        return jax.random.normal(k, (1, D), jnp.float32) * 0.1

    return dict(
        S=jax.random.normal(keys[0], (1, D), jnp.float32) * s,   # PMA seed (1 seed)
        Wq=w(keys[1]), bq=b(keys[2]),
        Wk=w(keys[3]), bk=b(keys[4]),
        Wv=w(keys[5]), bv=b(keys[6]),
        Wo=w(keys[7]), bo=b(keys[8]),
        Wg=w(keys[9]),                                           # GCNConv linear (out, in)
        bg=jnp.zeros((1, D), jnp.float32),                       # GCNConv bias
        alpha=jnp.full((1, D), 0.25, jnp.float32),               # PReLU default init
    )


def reference_forward(x, zone, adj_norm, params, num_heads):
    """Pure numpy reference matching the PyTorch forward semantics."""
    x = np.asarray(x); zone = np.asarray(zone); A = np.asarray(adj_norm)
    p = {k: np.asarray(v) for k, v in params.items()}
    N, D = x.shape; R = A.shape[0]; dh = D // num_heads
    q = p['S'] @ p['Wq'].T + p['bq']                    # (1, D)
    K = x @ p['Wk'].T + p['bk']
    V = x @ p['Wv'].T + p['bv']
    embs = np.zeros((R, D), np.float32)
    for r in range(R):
        idx = np.nonzero(zone == r)[0]
        Kr, Vr = K[idx], V[idx]
        out = np.zeros(D, np.float32)
        for h in range(num_heads):
            hs = slice(h * dh, (h + 1) * dh)
            s = (Kr[:, hs] @ q[0, hs]) / math.sqrt(D)
            s = s - s.max()
            a = np.exp(s); a = a / a.sum()
            out[hs] = q[0, hs] + a @ Vr[:, hs]
        out = out + np.maximum(out @ p['Wo'].T + p['bo'][0], 0.0)
        embs[r] = out
    G = A @ (embs @ p['Wg'].T) + p['bg'][0]
    return np.where(G > 0, G, p['alpha'][0] * G)


if __name__ == "__main__":
    D = 32      # hidden_channels
    H = 4       # num_heads
    N = 1200    # number of POIs (pads to 1536 -> 3 POI tiles, exercises online path)
    R = 10      # number of regions (zone.max()+1)

    key = jax.random.PRNGKey(0)
    k_x, k_perm, k_params = jax.random.split(key, 3)

    x = jax.random.normal(k_x, (N, D), jnp.float32)
    zone_base = jnp.arange(N, dtype=jnp.int32) % R          # every region non-empty
    zone = jnp.asarray(jax.random.permutation(k_perm, zone_base))

    # region_adjacency given as an edge_index (ring over regions); densify and
    # GCN-normalize (A_hat = D^-1/2 (A + I) D^-1/2) in plain numpy glue
    # (this is the cached=True precompute of GCNConv).
    src = np.concatenate([np.arange(R), (np.arange(R) + 1) % R])
    dst = np.concatenate([(np.arange(R) + 1) % R, np.arange(R)])
    A = np.zeros((R, R), np.float32)
    A[src, dst] = 1.0
    A_hat = A + np.eye(R, dtype=np.float32)
    dinv = 1.0 / np.sqrt(A_hat.sum(axis=1))
    adj_norm = jnp.asarray(dinv[:, None] * A_hat * dinv[None, :])

    params = init_params(k_params, D)
    prep = prepare_params(params, H)          # one-time host prep (hoisted)

    out = poi2region_forward(x, zone, adj_norm, prep)
    out = jax.block_until_ready(out)

    # Reference on bf16-rounded storage (the kernel stores x / fused weights in
    # bf16 with f32 accumulation); tolerance covers bf16 activation casts, the
    # host-side fold-then-round of the score weights, and the approximate
    # reciprocal used for the softmax normalization.
    def rnd(a):
        return np.asarray(jnp.asarray(a).astype(jnp.bfloat16).astype(jnp.float32))

    params_r = dict(params)
    for kname in ('S', 'Wq', 'Wk', 'Wv', 'Wo', 'Wg'):
        params_r[kname] = rnd(params[kname])
    ref = reference_forward(rnd(x), zone, adj_norm, params_r, H)

    assert out.shape == (R, D)
    np.testing.assert_allclose(np.asarray(out), ref, rtol=3e-2, atol=3e-2)
    print("KERNEL_OK")
</pallas_src>

<mosaic_0001>
module attributes {stable_mosaic.version = 11 : i64} {
  func.func @_poi2region_kernel(%arg0: i32, %arg1: memref<512x32xbf16, #tpu.memory_space<vmem>>, %arg2: memref<1x512xi32, #tpu.memory_space<vmem>>, %arg3: memref<1x32xf32, #tpu.memory_space<vmem>>, %arg4: memref<32x36xbf16, #tpu.memory_space<vmem>>, %arg5: memref<1x36xf32, #tpu.memory_space<vmem>>, %arg6: memref<32x32xbf16, #tpu.memory_space<vmem>>, %arg7: memref<1x32xf32, #tpu.memory_space<vmem>>, %arg8: memref<4x32xf32, #tpu.memory_space<vmem>>, %arg9: memref<10x10xf32, #tpu.memory_space<vmem>>, %arg10: memref<32x32xbf16, #tpu.memory_space<vmem>>, %arg11: memref<1x32xf32, #tpu.memory_space<vmem>>, %arg12: memref<1x32xf32, #tpu.memory_space<vmem>>, %arg13: memref<10x32xf32, #tpu.memory_space<vmem>>, %arg14: memref<1x4xf32, #tpu.memory_space<vmem>>, %arg15: memref<10x4xf32, #tpu.memory_space<vmem>>, %arg16: memref<10x32xf32, #tpu.memory_space<vmem>>) attributes {dimension_semantics = [#tpu.dimension_semantics<arbitrary>], iteration_bounds = array<i64: 3>, scalar_prefetch = 0 : i64, scratch_operands = 3 : i64, tpu.core_type = #tpu.core_type<tc>, window_params = [{transform_indices = @transform_0, window_bounds = array<i64: 512, 32>}, {transform_indices = @transform_1, window_bounds = array<i64: 1, 512>}, {pipeline_mode = #tpu.pipeline_mode<synchronous>, transform_indices = @transform_2, window_bounds = array<i64: 1, 32>}, {pipeline_mode = #tpu.pipeline_mode<synchronous>, transform_indices = @transform_3, window_bounds = array<i64: 32, 36>}, {pipeline_mode = #tpu.pipeline_mode<synchronous>, transform_indices = @transform_4, window_bounds = array<i64: 1, 36>}, {pipeline_mode = #tpu.pipeline_mode<synchronous>, transform_indices = @transform_5, window_bounds = array<i64: 32, 32>}, {pipeline_mode = #tpu.pipeline_mode<synchronous>, transform_indices = @transform_6, window_bounds = array<i64: 1, 32>}, {pipeline_mode = #tpu.pipeline_mode<synchronous>, transform_indices = @transform_7, window_bounds = array<i64: 4, 32>}, {pipeline_mode = #tpu.pipeline_mode<synchronous>, transform_indices = @transform_8, window_bounds = array<i64: 10, 10>}, {pipeline_mode = #tpu.pipeline_mode<synchronous>, transform_indices = @transform_9, window_bounds = array<i64: 32, 32>}, {pipeline_mode = #tpu.pipeline_mode<synchronous>, transform_indices = @transform_10, window_bounds = array<i64: 1, 32>}, {pipeline_mode = #tpu.pipeline_mode<synchronous>, transform_indices = @transform_11, window_bounds = array<i64: 1, 32>}, {pipeline_mode = #tpu.pipeline_mode<synchronous>, transform_indices = @transform_12, window_bounds = array<i64: 10, 32>}]} {
    %c0_i32 = arith.constant 0 : i32
    %0 = arith.cmpi eq, %arg0, %c0_i32 : i32
    %1 = arith.extui %0 : i1 to i32
    %c0_i32_0 = arith.constant 0 : i32
    %2 = arith.cmpi ne, %1, %c0_i32_0 : i32
    scf.if %2 {
      %cst_28 = arith.constant -1.000000e+30 : f32
      %51 = vector.broadcast %cst_28 : f32 to vector<1x4xf32>
      %c0_29 = arith.constant 0 : index
      %c0_30 = arith.constant 0 : index
      %52 = vector.load %arg14[%c0_29, %c0_30] : memref<1x4xf32, #tpu.memory_space<vmem>>, vector<1x4xf32>
      tpu.vector_store %arg14[%c0_29, %c0_30], %51 {strides = array<i32>} : memref<1x4xf32, #tpu.memory_space<vmem>>, vector<1x4xf32>,
      %cst_31 = arith.constant 0.000000e+00 : f32
      %53 = vector.broadcast %cst_31 : f32 to vector<10x4xf32>
      %c0_32 = arith.constant 0 : index
      %c0_33 = arith.constant 0 : index
      %54 = vector.load %arg15[%c0_32, %c0_33] : memref<10x4xf32, #tpu.memory_space<vmem>>, vector<10x4xf32>
      tpu.vector_store %arg15[%c0_32, %c0_33], %53 {strides = array<i32>} : memref<10x4xf32, #tpu.memory_space<vmem>>, vector<10x4xf32>,
      %cst_34 = arith.constant 0.000000e+00 : f32
      %55 = vector.broadcast %cst_34 : f32 to vector<10x32xf32>
      %c0_35 = arith.constant 0 : index
      %c0_36 = arith.constant 0 : index
      %56 = vector.load %arg16[%c0_35, %c0_36] : memref<10x32xf32, #tpu.memory_space<vmem>>, vector<10x32xf32>
      tpu.vector_store %arg16[%c0_35, %c0_36], %55 {strides = array<i32>} : memref<10x32xf32, #tpu.memory_space<vmem>>, vector<10x32xf32>,
    } else {
    }
    %c0 = arith.constant 0 : index
    %c0_1 = arith.constant 0 : index
    %3 = vector.load %arg8[%c0, %c0_1] : memref<4x32xf32, #tpu.memory_space<vmem>>, vector<4x32xf32>
    %4 = arith.truncf %3 : vector<4x32xf32> to vector<4x32xbf16>
    %c0_2 = arith.constant 0 : index
    %c0_3 = arith.constant 0 : index
    %5 = vector.load %arg1[%c0_2, %c0_3] : memref<512x32xbf16, #tpu.memory_space<vmem>>, vector<512x32xbf16>
    %c0_4 = arith.constant 0 : index
    %c0_5 = arith.constant 0 : index
    %6 = vector.load %arg4[%c0_4, %c0_5] : memref<32x36xbf16, #tpu.memory_space<vmem>>, vector<32x36xbf16>
    %cst = arith.constant dense<0.000000e+00> : vector<512x36xf32>
    %7 = tpu.matmul %5, %6, %cst {dimension_numbers = #tpu.dot_dimension_numbers<[1], [0], [0], [1], [0, 0, 1, 1], [], []>} : vector<512x32xbf16>, vector<32x36xbf16>, vector<512x36xf32> -> vector<512x36xf32>
    %c0_6 = arith.constant 0 : index
    %c0_7 = arith.constant 0 : index
    %8 = vector.load %arg5[%c0_6, %c0_7] : memref<1x36xf32, #tpu.memory_space<vmem>>, vector<1x36xf32>
    %9 = vector.broadcast %8 : vector<1x36xf32> to vector<512x36xf32>
    %10 = arith.addf %7, %9 : vector<512x36xf32>
    %11 = vector.extract_strided_slice %10 {offsets = [0, 0], sizes = [512, 4], strides = [1, 1]} : vector<512x36xf32> to vector<512x4xf32>
    %12 = vector.extract_strided_slice %10 {offsets = [0, 4], sizes = [512, 32], strides = [1, 1]} : vector<512x36xf32> to vector<512x32xf32>
    %c0_8 = arith.constant 0 : index
    %c0_9 = arith.constant 0 : index
    %13 = vector.load %arg14[%c0_8, %c0_9] : memref<1x4xf32, #tpu.memory_space<vmem>>, vector<1x4xf32>
    %cst_10 = arith.constant dense<0xFF800000> : vector<4xf32>
    %14 = vector.multi_reduction <maximumf>, %11, %cst_10 [0] : vector<512x4xf32> to vector<4xf32>
    %15 = vector.shape_cast %14 : vector<4xf32> to vector<1x4xf32>
    %16 = arith.maximumf %13, %15 : vector<1x4xf32>
    %17 = arith.subf %13, %16 : vector<1x4xf32>
    %18 = math.exp %17 : vector<1x4xf32>
    %19 = vector.broadcast %16 : vector<1x4xf32> to vector<512x4xf32>
    %20 = arith.subf %11, %19 : vector<512x4xf32>
    %21 = math.exp %20 : vector<512x4xf32>
    %22 = arith.truncf %21 : vector<512x4xf32> to vector<512x4xbf16>
    %c0_11 = arith.constant 0 : index
    %c0_12 = arith.constant 0 : index
    %23 = vector.load %arg2[%c0_11, %c0_12] : memref<1x512xi32, #tpu.memory_space<vmem>>, vector<1x512xi32>
    %24 = tpu.iota {dimensions = array<i32: 0>} : vector<10x1xi32>
    %25 = vector.broadcast %24 : vector<10x1xi32> to vector<10x512xi32>
    %26 = vector.broadcast %23 : vector<1x512xi32> to vector<10x512xi32>
    %27 = arith.cmpi eq, %25, %26 : vector<10x512xi32>
    %28 = arith.extui %27 : vector<10x512xi1> to vector<10x512xi32>
    %29 = arith.sitofp %28 : vector<10x512xi32> to vector<10x512xf32>
    %30 = arith.truncf %29 : vector<10x512xf32> to vector<10x512xbf16>
    %c0_13 = arith.constant 0 : index
    %c0_14 = arith.constant 0 : index
    %31 = vector.load %arg15[%c0_13, %c0_14] : memref<10x4xf32, #tpu.memory_space<vmem>>, vector<10x4xf32>
    %32 = vector.broadcast %18 : vector<1x4xf32> to vector<10x4xf32>
    %33 = arith.mulf %31, %32 : vector<10x4xf32>
    %cst_15 = arith.constant dense<0.000000e+00> : vector<10x4xf32>
    %34 = tpu.matmul %30, %22, %cst_15 {dimension_numbers = #tpu.dot_dimension_numbers<[1], [0], [0], [1], [0, 0, 1, 1], [], []>} : vector<10x512xbf16>, vector<512x4xbf16>, vector<10x4xf32> -> vector<10x4xf32>
    %35 = arith.addf %33, %34 : vector<10x4xf32>
    %c0_16 = arith.constant 0 : index
    %c0_17 = arith.constant 0 : index
    %36 = vector.load %arg15[%c0_16, %c0_17] : memref<10x4xf32, #tpu.memory_space<vmem>>, vector<10x4xf32>
    tpu.vector_store %arg15[%c0_16, %c0_17], %35 {strides = array<i32>} : memref<10x4xf32, #tpu.memory_space<vmem>>, vector<10x4xf32>,
    %cst_18 = arith.constant dense<0.000000e+00> : vector<512x32xf32>
    %37 = tpu.matmul %22, %4, %cst_18 {dimension_numbers = #tpu.dot_dimension_numbers<[1], [0], [0], [1], [0, 0, 1, 1], [], []>} : vector<512x4xbf16>, vector<4x32xbf16>, vector<512x32xf32> -> vector<512x32xf32>
    %38 = arith.mulf %12, %37 : vector<512x32xf32>
    %39 = arith.truncf %38 : vector<512x32xf32> to vector<512x32xbf16>
    %cst_19 = arith.constant dense<0.000000e+00> : vector<10x32xf32>
    %40 = tpu.matmul %30, %39, %cst_19 {dimension_numbers = #tpu.dot_dimension_numbers<[1], [0], [0], [1], [0, 0, 1, 1], [], []>} : vector<10x512xbf16>, vector<512x32xbf16>, vector<10x32xf32> -> vector<10x32xf32>
    %cst_20 = arith.constant dense<0.000000e+00> : vector<1x32xf32>
    %41 = tpu.matmul %18, %3, %cst_20 {dimension_numbers = #tpu.dot_dimension_numbers<[1], [0], [0], [1], [0, 0, 1, 1], [], []>} : vector<1x4xf32>, vector<4x32xf32>, vector<1x32xf32> -> vector<1x32xf32>
    %c0_21 = arith.constant 0 : index
    %c0_22 = arith.constant 0 : index
    %42 = vector.load %arg16[%c0_21, %c0_22] : memref<10x32xf32, #tpu.memory_space<vmem>>, vector<10x32xf32>
    %43 = vector.broadcast %41 : vector<1x32xf32> to vector<10x32xf32>
    %44 = arith.mulf %42, %43 : vector<10x32xf32>
    %45 = arith.addf %44, %40 : vector<10x32xf32>
    %c0_23 = arith.constant 0 : index
    %c0_24 = arith.constant 0 : index
    %46 = vector.load %arg16[%c0_23, %c0_24] : memref<10x32xf32, #tpu.memory_space<vmem>>, vector<10x32xf32>
    tpu.vector_store %arg16[%c0_23, %c0_24], %45 {strides = array<i32>} : memref<10x32xf32, #tpu.memory_space<vmem>>, vector<10x32xf32>,
    %c0_25 = arith.constant 0 : index
    %c0_26 = arith.constant 0 : index
    %47 = vector.load %arg14[%c0_25, %c0_26] : memref<1x4xf32, #tpu.memory_space<vmem>>, vector<1x4xf32>
    tpu.vector_store %arg14[%c0_25, %c0_26], %16 {strides = array<i32>} : memref<1x4xf32, #tpu.memory_space<vmem>>, vector<1x4xf32>,
    %c2_i32 = arith.constant 2 : i32
    %48 = arith.cmpi eq, %arg0, %c2_i32 : i32
    %49 = arith.extui %48 : i1 to i32
    %c0_i32_27 = arith.constant 0 : i32
    %50 = arith.cmpi ne, %49, %c0_i32_27 : i32
    scf.if %50 {
      %c0_28 = arith.constant 0 : index
      %c0_29 = arith.constant 0 : index
      %51 = vector.load %arg15[%c0_28, %c0_29] : memref<10x4xf32, #tpu.memory_space<vmem>>, vector<10x4xf32>
      %cst_30 = arith.constant 1.000000e-30 : f32
      %52 = vector.broadcast %cst_30 : f32 to vector<10x4xf32>
      %53 = arith.maximumf %51, %52 : vector<10x4xf32>
      %54 = tpu.reciprocal %53 {approx = true} : vector<10x4xf32> -> vector<10x4xf32>
      %c0_31 = arith.constant 0 : index
      %c0_32 = arith.constant 0 : index
      %55 = vector.load %arg16[%c0_31, %c0_32] : memref<10x32xf32, #tpu.memory_space<vmem>>, vector<10x32xf32>
      %cst_33 = arith.constant dense<0.000000e+00> : vector<10x32xf32>
      %56 = tpu.matmul %54, %3, %cst_33 {dimension_numbers = #tpu.dot_dimension_numbers<[1], [0], [0], [1], [0, 0, 1, 1], [], []>} : vector<10x4xf32>, vector<4x32xf32>, vector<10x32xf32> -> vector<10x32xf32>
      %57 = arith.mulf %55, %56 : vector<10x32xf32>
      %c0_34 = arith.constant 0 : index
      %c0_35 = arith.constant 0 : index
      %58 = vector.load %arg3[%c0_34, %c0_35] : memref<1x32xf32, #tpu.memory_space<vmem>>, vector<1x32xf32>
      %59 = vector.broadcast %58 : vector<1x32xf32> to vector<10x32xf32>
      %60 = arith.addf %57, %59 : vector<10x32xf32>
      %61 = arith.truncf %60 : vector<10x32xf32> to vector<10x32xbf16>
      %c0_36 = arith.constant 0 : index
      %c0_37 = arith.constant 0 : index
      %62 = vector.load %arg6[%c0_36, %c0_37] : memref<32x32xbf16, #tpu.memory_space<vmem>>, vector<32x32xbf16>
      %cst_38 = arith.constant dense<0.000000e+00> : vector<10x32xf32>
      %63 = tpu.matmul %61, %62, %cst_38 {dimension_numbers = #tpu.dot_dimension_numbers<[1], [0], [0], [1], [0, 0, 1, 1], [], []>} : vector<10x32xbf16>, vector<32x32xbf16>, vector<10x32xf32> -> vector<10x32xf32>
      %c0_39 = arith.constant 0 : index
      %c0_40 = arith.constant 0 : index
      %64 = vector.load %arg7[%c0_39, %c0_40] : memref<1x32xf32, #tpu.memory_space<vmem>>, vector<1x32xf32>
      %65 = vector.broadcast %64 : vector<1x32xf32> to vector<10x32xf32>
      %66 = arith.addf %63, %65 : vector<10x32xf32>
      %cst_41 = arith.constant 0.000000e+00 : f32
      %67 = vector.broadcast %cst_41 : f32 to vector<10x32xf32>
      %68 = arith.maximumf %66, %67 : vector<10x32xf32>
      %69 = arith.addf %60, %68 : vector<10x32xf32>
      %c0_42 = arith.constant 0 : index
      %c0_43 = arith.constant 0 : index
      %70 = vector.load %arg9[%c0_42, %c0_43] : memref<10x10xf32, #tpu.memory_space<vmem>>, vector<10x10xf32>
      %71 = arith.truncf %69 : vector<10x32xf32> to vector<10x32xbf16>
      %c0_44 = arith.constant 0 : index
      %c0_45 = arith.constant 0 : index
      %72 = vector.load %arg10[%c0_44, %c0_45] : memref<32x32xbf16, #tpu.memory_space<vmem>>, vector<32x32xbf16>
      %cst_46 = arith.constant dense<0.000000e+00> : vector<10x32xf32>
      %73 = tpu.matmul %71, %72, %cst_46 {dimension_numbers = #tpu.dot_dimension_numbers<[1], [0], [0], [1], [0, 0, 1, 1], [], []>} : vector<10x32xbf16>, vector<32x32xbf16>, vector<10x32xf32> -> vector<10x32xf32>
      %cst_47 = arith.constant dense<0.000000e+00> : vector<10x32xf32>
      %74 = tpu.matmul %70, %73, %cst_47 {dimension_numbers = #tpu.dot_dimension_numbers<[1], [0], [0], [1], [0, 0, 1, 1], [], []>} : vector<10x10xf32>, vector<10x32xf32>, vector<10x32xf32> -> vector<10x32xf32>
      %c0_48 = arith.constant 0 : index
      %c0_49 = arith.constant 0 : index
      %75 = vector.load %arg11[%c0_48, %c0_49] : memref<1x32xf32, #tpu.memory_space<vmem>>, vector<1x32xf32>
      %76 = vector.broadcast %75 : vector<1x32xf32> to vector<10x32xf32>
      %77 = arith.addf %74, %76 : vector<10x32xf32>
      %c0_50 = arith.constant 0 : index
      %c0_51 = arith.constant 0 : index
      %78 = vector.load %arg12[%c0_50, %c0_51] : memref<1x32xf32, #tpu.memory_space<vmem>>, vector<1x32xf32>
      %cst_52 = arith.constant 0.000000e+00 : f32
      %79 = vector.broadcast %cst_52 : f32 to vector<10x32xf32>
      %80 = arith.cmpf ogt, %77, %79 : vector<10x32xf32>
      %81 = vector.broadcast %78 : vector<1x32xf32> to vector<10x32xf32>
      %82 = arith.mulf %81, %77 : vector<10x32xf32>
      %83 = arith.select %80, %77, %82 : vector<10x32xi1>, vector<10x32xf32>
      %c0_53 = arith.constant 0 : index
      %c0_54 = arith.constant 0 : index
      %84 = vector.load %arg13[%c0_53, %c0_54] : memref<10x32xf32, #tpu.memory_space<vmem>>, vector<10x32xf32>
      tpu.vector_store %arg13[%c0_53, %c0_54], %83 {strides = array<i32>} : memref<10x32xf32, #tpu.memory_space<vmem>>, vector<10x32xf32>,
    } else {
    }
    return
  }
  func.func @transform_0(%arg0: i32) -> (i32, i32) {
    %c0_i32 = arith.constant 0 : i32
    %c0_i32_0 = arith.constant 0 : i32
    return %arg0, %c0_i32 : i32, i32
  }
  func.func @transform_1(%arg0: i32) -> (i32, i32) {
    %c0_i32 = arith.constant 0 : i32
    %c0_i32_0 = arith.constant 0 : i32
    return %c0_i32, %arg0 : i32, i32
  }
  func.func @transform_2(%arg0: i32) -> (i32, i32) {
    %c0_i32 = arith.constant 0 : i32
    %c0_i32_0 = arith.constant 0 : i32
    %c0_i32_1 = arith.constant 0 : i32
    return %c0_i32, %c0_i32_0 : i32, i32
  }
  func.func @transform_3(%arg0: i32) -> (i32, i32) {
    %c0_i32 = arith.constant 0 : i32
    %c0_i32_0 = arith.constant 0 : i32
    %c0_i32_1 = arith.constant 0 : i32
    return %c0_i32, %c0_i32_0 : i32, i32
  }
  func.func @transform_4(%arg0: i32) -> (i32, i32) {
    %c0_i32 = arith.constant 0 : i32
    %c0_i32_0 = arith.constant 0 : i32
    %c0_i32_1 = arith.constant 0 : i32
    return %c0_i32, %c0_i32_0 : i32, i32
  }
  func.func @transform_5(%arg0: i32) -> (i32, i32) {
    %c0_i32 = arith.constant 0 : i32
    %c0_i32_0 = arith.constant 0 : i32
    %c0_i32_1 = arith.constant 0 : i32
    return %c0_i32, %c0_i32_0 : i32, i32
  }
  func.func @transform_6(%arg0: i32) -> (i32, i32) {
    %c0_i32 = arith.constant 0 : i32
    %c0_i32_0 = arith.constant 0 : i32
    %c0_i32_1 = arith.constant 0 : i32
    return %c0_i32, %c0_i32_0 : i32, i32
  }
  func.func @transform_7(%arg0: i32) -> (i32, i32) {
    %c0_i32 = arith.constant 0 : i32
    %c0_i32_0 = arith.constant 0 : i32
    %c0_i32_1 = arith.constant 0 : i32
    return %c0_i32, %c0_i32_0 : i32, i32
  }
  func.func @transform_8(%arg0: i32) -> (i32, i32) {
    %c0_i32 = arith.constant 0 : i32
    %c0_i32_0 = arith.constant 0 : i32
    %c0_i32_1 = arith.constant 0 : i32
    return %c0_i32, %c0_i32_0 : i32, i32
  }
  func.func @transform_9(%arg0: i32) -> (i32, i32) {
    %c0_i32 = arith.constant 0 : i32
    %c0_i32_0 = arith.constant 0 : i32
    %c0_i32_1 = arith.constant 0 : i32
    return %c0_i32, %c0_i32_0 : i32, i32
  }
  func.func @transform_10(%arg0: i32) -> (i32, i32) {
    %c0_i32 = arith.constant 0 : i32
    %c0_i32_0 = arith.constant 0 : i32
    %c0_i32_1 = arith.constant 0 : i32
    return %c0_i32, %c0_i32_0 : i32, i32
  }
  func.func @transform_11(%arg0: i32) -> (i32, i32) {
    %c0_i32 = arith.constant 0 : i32
    %c0_i32_0 = arith.constant 0 : i32
    %c0_i32_1 = arith.constant 0 : i32
    return %c0_i32, %c0_i32_0 : i32, i32
  }
  func.func @transform_12(%arg0: i32) -> (i32, i32) {
    %c0_i32 = arith.constant 0 : i32
    %c0_i32_0 = arith.constant 0 : i32
    %c0_i32_1 = arith.constant 0 : i32
    return %c0_i32, %c0_i32_0 : i32, i32
  }
}

</mosaic_0001>

<bundles_post_ra>
// kernel: poi2region_forward.1
= control target key start
LH: loop header
LB: loop body
LE: loop exit
PB: predicated region body
PF: predicated region fallthrough
CT: control target
= control target key end

     0   :  { %17 = vsyncpa [#allocation6], 0  ;;  %s3075_s21 = smov 0   ;;  %s4392_s0 = inlined_call_operand.vmem [shape: bf16[1536,32], index: 0, kind: input, shape index: {}]   ;;  %s4393_s1 = inlined_call_operand.vmem [shape: s32[1,1536], index: 1, kind: input, shape index: {}]   ;;  %s4394_s2 = inlined_call_operand.vmem [shape: f32[1,32], index: 2, kind: input, shape index: {}]   ;;  %s4395_s3 = inlined_call_operand.vmem [shape: bf16[32,36], index: 3, kind: input, shape index: {}]   ;;  %s4396_s4 = inlined_call_operand.vmem [shape: f32[1,36], index: 4, kind: input, shape index: {}]   ;;  %s4397_s5 = inlined_call_operand.vmem [shape: bf16[32,32], index: 5, kind: input, shape index: {}]   ;;  %s4398_s6 = inlined_call_operand.vmem [shape: f32[1,32], index: 6, kind: input, shape index: {}]   ;;  %s4399_s7 = inlined_call_operand.vmem [shape: f32[4,32], index: 7, kind: input, shape index: {}]   ;;  %s4400_s8 = inlined_call_operand.vmem [shape: f32[10,10], index: 8, kind: input, shape index: {}]   ;;  %s4401_s9 = inlined_call_operand.vmem [shape: bf16[32,32], index: 9, kind: input, shape index: {}]   ;;  %s4402_s10 = inlined_call_operand.vmem [shape: f32[1,32], index: 10, kind: input, shape index: {}]   ;;  %s4403_s11 = inlined_call_operand.vmem [shape: f32[1,32], index: 11, kind: input, shape index: {}]   ;;  %s4404_s12 = inlined_call_operand.hbm [shape: f32[10,32], index: 12, kind: output, shape index: {}]  }
   0x1 LB: > { %s3081_s22 = sadd.s32 4294967295, %s3000_s21   ;;  %p2499_p0 = scmp.ge.s32.totalorder %s3000_s21, 1  ;;  %s3000_s21 = sphi %s3075_s21, %s23_s21  }
   0x2   : > { %p369_p1 = scmp.lt.s32.totalorder %s3000_s21, 4 }
   0x4   : > { %p370_p2 = pnand %p2499_p0, %p369_p1 }
   0x6   : > { %373 = sbr.rel (%p370_p2) target bundleno = 1991 (0x7c7), region = 68 }
   0xb   : > { %s2500_s23 = sshll.u32 %s3081_s22, 6  ;;  %s2502_s24 = sshll.u32 %s3081_s22, 2 }
   0xc   : > { %p411_p3 = scmp.lt.s32.totalorder %s2500_s23, 191  ;;  %p417_p4 = scmp.lt.s32.totalorder %s2502_s24, 11 }
   0xd   : > { %p2503_p5 = scmp.ne.s32.totalorder %s3081_s22, 0 }
   0xe   : > { %s4645_s23 = smov (!%p411_p3, %s2500_s23), 191  ;;  %s4647_s24 = smov (!%p417_p4, %s2502_s24), 11 }
   0xf   : > { %s2501_s25 = sshll.u32 %s4645_s23, 2  ;;  %s419_s13 = scalar_lea.vmem %s4393_s1, %s4647_s24 }
  0x10   : > { %s3092_s28 = scalar_lea.vmem %s4392_s0, %s2501_s25  ;;  %425 = sbr.rel (%p2503_p5) target bundleno = 27 (0x1b), region = 72 }
  0x15   : > { %vm426_vm0 = vcmask 24576   ;;  %vm428_vm1 = vcmask 31744   ;;  %v3002_v0 = vmov -1e+30   ;;  %vm430_vm2 = vcmask 25600  }
  0x16   : > { %427 = vst.msk [vmem:[#allocation2] sm:$0x1] %vm426_vm0, %v3002_v0  ;;  %vm432_vm3 = vcmask 261120   ;;  %v3003_v1 = vmov 0.0   ;;  %vm434_vm4 = vcmask 254976  }
  0x17   : > { %429 = vst.msk [vmem:[#allocation3] sm:$0xff] %vm428_vm1, %v3003_v1 }
  0x18   : > { %431 = vst.msk [vmem:[#allocation3 + $0x8] sm:$0x3] %vm430_vm2, %v3003_v1 }
  0x19   : > { %433 = vst.msk [vmem:[#allocation4] sm:$0xff] %vm432_vm3, %v3003_v1 }
  0x1a   : > { %435 = vst.msk [vmem:[#allocation4 + $0x8] sm:$0x3] %vm434_vm4, %v3003_v1 }
  0x1b PF: > { %v2792_v2 = vld [vmem:[%s4395_s3 + $0x8] sm:$0xff]  ;;  %v2791_v3 = vld [vmem:[%s4395_s3] sm:$0xff]  ;;  %vm682_vm5 = vcmask 261120   ;;  %v2761_v8 = vld [vmem:[%s3092_s28 + $0x10] sm:$0xff]  ;;  %vm949_vm6 = vcmask 31744   ;;  %vm2259_vm7 = vcmask 24576  }
  0x1c   : > { %785 = vmatpush.bf16.msra.mxu0 %v2792_v2  ;;  %2797 = vmatpush.bf16.msra.mxu1 %v2792_v2  ;;  %v2759_v4 = vld [vmem:[%s3092_s28] sm:$0xff]  ;;  %v2760_v6 = vld [vmem:[%s3092_s28 + $0x8] sm:$0xff]  ;;  %v2781_v9 = vld [vmem:[%s3092_s28 + $0xb0] sm:$0xff]  ;;  %vm1514_vm11 = vcmask 1041408   ;;  %s3005_s26 = smov 4   ;;  %s3006_s27 = smov 124  }
  0x1d   : > { %v2779_v5 = vld [vmem:[%s3092_s28 + $0xa0] sm:$0xff]  ;;  %v2780_v7 = vld [vmem:[%s3092_s28 + $0xa8] sm:$0xff]  ;;  %v2762_v10 = vld [vmem:[%s3092_s28 + $0x18] sm:$0xff]  ;;  %p2730_p6 = scmp.ne.s32.totalorder %s3081_s22, 2 }
  0x1e   : > { %v2782_v11 = vld [vmem:[%s3092_s28 + $0xb8] sm:$0xff]  ;;  %v2763_v12 = vld [vmem:[%s3092_s28 + $0x20] sm:$0xff]  ;;  %v2764_v14 = vld [vmem:[%s3092_s28 + $0x28] sm:$0xff] }
  0x1f   : > { %v2783_v13 = vld [vmem:[%s3092_s28 + $0xc0] sm:$0xff]  ;;  %v2784_v15 = vld [vmem:[%s3092_s28 + $0xc8] sm:$0xff]  ;;  %v2765_v16 = vld [vmem:[%s3092_s28 + $0x30] sm:$0xff] }
  0x20   : > { %786 = vmatpush.bf16.msra.mxu0 %v2791_v3  ;;  %2798 = vmatpush.bf16.msra.mxu1 %v2791_v3  ;;  %v2785_v17 = vld [vmem:[%s3092_s28 + $0xd0] sm:$0xff]  ;;  %v2766_v18 = vld [vmem:[%s3092_s28 + $0x38] sm:$0xff]  ;;  %v2767_v20 = vld [vmem:[%s3092_s28 + $0x40] sm:$0xff] }
  0x21   : > { %v2786_v19 = vld [vmem:[%s3092_s28 + $0xd8] sm:$0xff]  ;;  %v2787_v21 = vld [vmem:[%s3092_s28 + $0xe0] sm:$0xff]  ;;  %v2768_v24 = vld [vmem:[%s3092_s28 + $0x48] sm:$0xff] }
  0x22   : > { %v2788_v25 = vld [vmem:[%s3092_s28 + $0xe8] sm:$0xff]  ;;  %v2769_v28 = vld [vmem:[%s3092_s28 + $0x50] sm:$0xff]  ;;  %v2770_v31 = vld [vmem:[%s3092_s28 + $0x58] sm:$0xff] }
  0x23   : > { %2640 = vmatmul.msk.bf16.vlgmr.msra.gmra.mxu0 %vm682_vm5, %v2759_v4  ;;  %2660 = vmatmul.msk.bf16.vlgmr.msra.gmra.mxu1 %vm682_vm5, %v2779_v5  ;;  %v2771_v34 = vld [vmem:[%s3092_s28 + $0x60] sm:$0xff]  ;;  %v2772_v37 = vld [vmem:[%s3092_s28 + $0x68] sm:$0xff]  ;;  %v2773_v42 = vld [vmem:[%s3092_s28 + $0x70] sm:$0xff] }
  0x24   : > { %v2774_v46 = vld [vmem:[%s3092_s28 + $0x78] sm:$0xff]  ;;  %v2789_v51 = vld [vmem:[%s3092_s28 + $0xf0] sm:$0xff]  ;;  %v2775_v52 = vld [vmem:[%s3092_s28 + $0x80] sm:$0xff] }
  0x25   : > { %v2790_v56 = vld [vmem:[%s3092_s28 + $0xf8] sm:$0xff]  ;;  %v2776_v57 = vld [vmem:[%s3092_s28 + $0x88] sm:$0xff]  ;;  %v2777_v62 = vld [vmem:[%s3092_s28 + $0x90] sm:$0xff] }
  0x26   : > { %v2778_v3 = vld [vmem:[%s3092_s28 + $0x98] sm:$0xff] }
  0x33   : > { %2641 = vmatmul.msk.bf16.gmra.mxu0 %vm682_vm5, %v2760_v6  ;;  %2661 = vmatmul.msk.bf16.gmra.mxu1 %vm682_vm5, %v2780_v7 }
  0x43   : > { %2642 = vmatmul.msk.bf16.gmra.mxu0 %vm682_vm5, %v2761_v8  ;;  %2662 = vmatmul.msk.bf16.gmra.mxu1 %vm682_vm5, %v2781_v9 }
  0x53   : > { %2643 = vmatmul.msk.bf16.gmra.mxu0 %vm682_vm5, %v2762_v10  ;;  %2663 = vmatmul.msk.bf16.gmra.mxu1 %vm682_vm5, %v2782_v11 }
  0x63   : > { %2644 = vmatmul.msk.bf16.gmra.mxu0 %vm682_vm5, %v2763_v12  ;;  %2664 = vmatmul.msk.bf16.gmra.mxu1 %vm682_vm5, %v2783_v13 }
  0x73   : > { %2645 = vmatmul.msk.bf16.gmra.mxu0 %vm682_vm5, %v2764_v14  ;;  %2665 = vmatmul.msk.bf16.gmra.mxu1 %vm682_vm5, %v2784_v15  ;;  %v3228_v14 = vld [vmem:[%s4396_s4] ss:$0 sm:$0xff] }
  0x83   : > { %2646 = vmatmul.msk.bf16.gmra.mxu0 %vm682_vm5, %v2765_v16  ;;  %2666 = vmatmul.msk.bf16.gmra.mxu1 %vm682_vm5, %v2785_v17 }
  0x93   : > { %2647 = vmatmul.msk.bf16.gmra.mxu0 %vm682_vm5, %v2766_v18  ;;  %2667 = vmatmul.msk.bf16.gmra.mxu1 %vm682_vm5, %v2786_v19 }
  0xa0   : > { %v3139_v22 = vpop.f32.mrf.mxu0  ;;  %v888_v39 = vpop.f32.mrf.mxu1 }
  0xa1   : > { %v3231_v15 = vadd.f32 %v3228_v14, %v888_v39 }
  0xa3   : > { %2648 = vmatmul.msk.bf16.gmra.mxu0 %vm682_vm5, %v2767_v20  ;;  %2668 = vmatmul.msk.bf16.gmra.mxu1 %vm682_vm5, %v2787_v21  ;;  %4487 = vst [vmem:[#allocation8_spill] sm:$0xff] %v3231_v15  ;;  %v1026_v17 = vsel %vm949_vm6, %v3231_v15, -inf }
  0xa8   : > { %v3143_v23 = vpop.f32.mrf.mxu0  ;;  %v890_v41 = vpop.f32.mrf.mxu1 }
  0xa9   : > { %v3234_v16 = vadd.f32 %v3228_v14, %v890_v41 }
  0xab   : > { %4488 = vst [vmem:[#allocation9_spill] sm:$0xff] %v3234_v16  ;;  %v1028_v18 = vsel %vm949_vm6, %v3234_v16, -inf }
  0xb0   : > { %v3147_v26 = vpop.f32.mrf.mxu0  ;;  %v893_v45 = vpop.f32.mrf.mxu1 }
  0xb1   : > { %v3241_v19 = vadd.f32 %v3228_v14, %v893_v45 }
  0xb3   : > { %2649 = vmatmul.msk.bf16.gmra.mxu0 %vm682_vm5, %v2768_v24  ;;  %2669 = vmatmul.msk.bf16.gmra.mxu1 %vm682_vm5, %v2788_v25  ;;  %4489 = vst [vmem:[#allocation10_spill] sm:$0xff] %v3241_v19  ;;  %v1027_v24 = vmax.f32 %v1028_v18, %v1026_v17  ;;  %v1030_v25 = vsel %vm949_vm6, %v3241_v19, -inf }
  0xb8   : > { %v3151_v27 = vpop.f32.mrf.mxu0  ;;  %v895_v48 = vpop.f32.mrf.mxu1 }
  0xc0   : > { %v3154_v29 = vpop.f32.mrf.mxu0  ;;  %v898_v50 = vpop.f32.mrf.mxu1 }
  0xc3   : > { %2650 = vmatmul.msk.bf16.gmra.mxu0 %vm682_vm5, %v2769_v28  ;;  %2670 = vmatmul.msk.bf16.gmra.mxu1 %vm682_vm5, %v2789_v51  ;;  %v3248_v28 = vadd.f32 %v3228_v14, %v895_v48 }
  0xc5   : > { %4490 = vst [vmem:[#allocation11_spill] sm:$0xff] %v3248_v28 }
  0xc8   : > { %v3157_v30 = vpop.f32.mrf.mxu0  ;;  %v900_v54 = vpop.f32.mrf.mxu1 }
  0xd0   : > { %v3160_v32 = vpop.f32.mrf.mxu0  ;;  %v903_v59 = vpop.f32.mrf.mxu1 }
  0xd3   : > { %2651 = vmatmul.msk.bf16.gmra.mxu0 %vm682_vm5, %v2770_v31  ;;  %2671 = vmatmul.msk.bf16.gmra.mxu1 %vm682_vm5, %v2790_v56  ;;  %v1035_v31 = vmax.f32 %v1027_v24, %v1030_v25 }
  0xd8   : > { %v3163_v33 = vpop.f32.mrf.mxu0  ;;  %v905_v61 = vpop.f32.mrf.mxu1 }
  0xe0   : > { %v3166_v35 = vpop.f32.mrf.mxu0  ;;  %v908_v0 = vpop.f32.mrf.mxu1 }
  0xe1   : > { %v3277_v18 = vadd.f32 %v3228_v14, %v908_v0 }
  0xe3   : > { %2652 = vmatmul.msk.bf16.gmra.mxu0 %vm682_vm5, %v2771_v34  ;;  %v1032_v34 = vsel %vm949_vm6, %v3248_v28, -inf  ;;  %4495 = vst [vmem:[#allocation16_spill] sm:$0xff] %v3277_v18  ;;  %v1042_v25 = vsel %vm949_vm6, %v3277_v18, -inf }
  0xe4   : > { %v1043_v41 = vmax.f32 %v1035_v31, %v1032_v34 }
  0xe8   : > { %v3169_v36 = vpop.f32.mrf.mxu0  ;;  %v910_v2 = vpop.f32.mrf.mxu1 }
  0xe9   : > { %v3284_v31 = vadd.f32 %v3228_v14, %v910_v2 }
  0xeb   : > { %4496 = vst [vmem:[#allocation17_spill] sm:$0xff] %v3284_v31 }
  0xf0   : > { %v3172_v38 = vpop.f32.mrf.mxu0  ;;  %v913_v6 = vpop.f32.mrf.mxu1 }
  0xf3   : > { %2653 = vmatmul.msk.bf16.gmra.mxu0 %vm682_vm5, %v2772_v37  ;;  %v3253_v37 = vadd.f32 %v3228_v14, %v898_v50 }
  0xf5   : > { %4491 = vst [vmem:[#allocation12_spill] sm:$0xff] %v3253_v37  ;;  %v1034_v45 = vsel %vm949_vm6, %v3253_v37, -inf }
  0xf6   : > { %v1051_v51 = vmax.f32 %v1043_v41, %v1034_v45  ;;  %v1044_v41 = vsel %vm949_vm6, %v3284_v31, -inf  ;;  %v3289_v45 = vadd.f32 %v3228_v14, %v913_v6  ;;  %v3372_v31 = vadd.f32 %v3228_v14, %v3169_v36 }
  0xf8   : > { %v3175_v40 = vpop.f32.mrf.mxu0  ;;  %v915_v8 = vpop.f32.mrf.mxu1  ;;  %4497 = vst [vmem:[#allocation18_spill] sm:$0xff] %v3289_v45 }
  0xf9   : > { %4506 = vst [vmem:[#allocation27_spill] sm:$0xff] %v3372_v31 }
 0x100   : > { %v3178_v43 = vpop.f32.mrf.mxu0  ;;  %v918_v10 = vpop.f32.mrf.mxu1 }
 0x103   : > { %2654 = vmatmul.msk.bf16.gmra.mxu0 %vm682_vm5, %v2773_v42 }
 0x108   : > { %v3181_v44 = vpop.f32.mrf.mxu0  ;;  %v920_v12 = vpop.f32.mrf.mxu1 }
 0x110   : > { %v3184_v47 = vpop.f32.mrf.mxu0  ;;  %v923_v21 = vpop.f32.mrf.mxu1 }
 0x113   : > { %2655 = vmatmul.msk.bf16.gmra.mxu0 %vm682_vm5, %v2774_v46  ;;  %v3260_v46 = vadd.f32 %v3228_v14, %v900_v54 }
 0x115   : > { %4492 = vst [vmem:[#allocation13_spill] sm:$0xff] %v3260_v46  ;;  %v1036_v48 = vsel %vm949_vm6, %v3260_v46, -inf }
 0x116   : > { %v1059_v50 = vmax.f32 %v1051_v51, %v1036_v48  ;;  %v1046_v48 = vsel %vm949_vm6, %v3289_v45, -inf }
 0x118   : > { %v3187_v49 = vpop.f32.mrf.mxu0  ;;  %v925_v42 = vpop.f32.mrf.mxu1 }
 0x120   : > { %v3192_v53 = vpop.f32.mrf.mxu0 }
 0x121   : > { %v3378_v45 = vadd.f32 %v3228_v14, %v3192_v53 }
 0x123   : > { %2656 = vmatmul.msk.bf16.gmra.mxu0 %vm682_vm5, %v2775_v52  ;;  %v3265_v52 = vadd.f32 %v3228_v14, %v903_v59  ;;  %4507 = vst [vmem:[#allocation28_spill] sm:$0xff] %v3378_v45 }
 0x125   : > { %4493 = vst [vmem:[#allocation14_spill] sm:$0xff] %v3265_v52 }
 0x128   : > { %v3195_v55 = vpop.f32.mrf.mxu0 }
 0x130   : > { %v3200_v58 = vpop.f32.mrf.mxu0 }
 0x133   : > { %2657 = vmatmul.msk.bf16.gmra.mxu0 %vm682_vm5, %v2776_v57  ;;  %v1038_v57 = vsel %vm949_vm6, %v3265_v52, -inf }
 0x134   : > { %v1067_v17 = vmax.f32 %v1059_v50, %v1038_v57  ;;  %v3296_v50 = vadd.f32 %v3228_v14, %v915_v8 }
 0x136   : > { %4498 = vst [vmem:[#allocation19_spill] sm:$0xff] %v3296_v50  ;;  %v1048_v2 = vsel %vm949_vm6, %v3296_v50, -inf }
 0x138   : > { %v3203_v60 = vpop.f32.mrf.mxu0 }
 0x140   : > { %v3206_v63 = vpop.f32.mrf.mxu0 }
 0x141   : > { %v3405_v16 = vadd.f32 %v3228_v14, %v3206_v63 }
 0x143   : > { %2658 = vmatmul.msk.bf16.gmra.mxu0 %vm682_vm5, %v2777_v62  ;;  %v3272_v62 = vadd.f32 %v3228_v14, %v905_v61  ;;  %4511 = vst [vmem:[#allocation32_spill] sm:$0xff] %v3405_v16 }
 0x145   : > { %4494 = vst [vmem:[#allocation15_spill] sm:$0xff] %v3272_v62  ;;  %v1040_v54 = vsel %vm949_vm6, %v3272_v62, -inf }
 0x146   : > { %v1029_v59 = vmax.f32 %v1040_v54, %v1067_v17  ;;  %v3301_v17 = vadd.f32 %v3228_v14, %v918_v10  ;;  %v3319_v10 = vadd.f32 %v3228_v14, %v3139_v22  ;;  %v3341_v22 = vadd.f32 %v3228_v14, %v3166_v35 }
 0x148   : > { %v3209_v1 = vpop.f32.mrf.mxu0  ;;  %v1037_v34 = vmax.f32 %v1029_v59, %v1042_v25  ;;  %4499 = vst [vmem:[#allocation20_spill] sm:$0xff] %v3301_v17  ;;  %v1050_v25 = vsel %vm949_vm6, %v3301_v17, -inf  ;;  %v962_v50 = vsel %vm949_vm6, %v3341_v22, -inf }
 0x149   : > { %4503 = vst [vmem:[#allocation24_spill] sm:$0xff] %v3341_v22 }
 0x14a   : > { %v1045_v0 = vmax.f32 %v1037_v34, %v1044_v41  ;;  %v3308_v34 = vadd.f32 %v3228_v14, %v920_v12  ;;  %v3327_v12 = vadd.f32 %v3228_v14, %v3154_v29  ;;  %v3346_v29 = vadd.f32 %v3228_v14, %v925_v42 }
 0x14b   : > { %v3364_v42 = vadd.f32 %v3228_v14, %v3178_v43 }
 0x14c   : > { %v1053_v57 = vmax.f32 %v1045_v0, %v1046_v48  ;;  %4500 = vst [vmem:[#allocation21_spill] sm:$0xff] %v3308_v34  ;;  %v1052_v8 = vsel %vm949_vm6, %v3308_v34, -inf  ;;  %v3313_v0 = vadd.f32 %v3228_v14, %v923_v21  ;;  %v3335_v21 = vadd.f32 %v3228_v14, %v3160_v32 }
 0x14d   : > { %4504 = vst [vmem:[#allocation25_spill] sm:$0xff] %v3346_v29  ;;  %v3354_v32 = vadd.f32 %v3228_v14, %v3151_v27  ;;  %v1056_v43 = vsel %vm949_vm6, %v3346_v29, -inf  ;;  %v970_v29 = vsel %vm949_vm6, %v3364_v42, -inf }
 0x14e   : > { %v1061_v59 = vmax.f32 %v1053_v57, %v1048_v2  ;;  %4501 = vst [vmem:[#allocation22_spill] sm:$0xff] %v3313_v0  ;;  %v3323_v57 = vadd.f32 %v3228_v14, %v3143_v23  ;;  %v3331_v2 = vadd.f32 %v3228_v14, %v3157_v30  ;;  %v1054_v23 = vsel %vm949_vm6, %v3313_v0, -inf }
 0x14f   : > { %4502 = vst [vmem:[#allocation23_spill] sm:$0xff] %v3335_v21  ;;  %v3350_v30 = vadd.f32 %v3228_v14, %v3147_v26  ;;  %v958_v27 = vsel %vm949_vm6, %v3335_v21, -inf  ;;  %v3389_v36 = vsel %vm949_vm6, %v3354_v32, -inf }
 0x150   : > { %v3212_v4 = vpop.f32.mrf.mxu0  ;;  %v1069_v41 = vmax.f32 %v1061_v59, %v1050_v25  ;;  %v951_v35 = vsel %vm949_vm6, %v3323_v57, -inf  ;;  %4505 = vst [vmem:[#allocation26_spill] sm:$0xff] %v3364_v42  ;;  %v956_v26 = vsel %vm949_vm6, %v3331_v2, -inf }
 0x151   : > { %v952_v17 = vsel %vm949_vm6, %v3350_v30, -inf  ;;  %v957_v0 = vmax.f32 %v951_v35, %v956_v26  ;;  %v978_v35 = vsel %vm949_vm6, %v3378_v45, -inf }
 0x152   : > { %v1074_v59 = vmax.f32 %v1052_v8, %v1069_v41  ;;  %v950_v41 = vsel %vm949_vm6, %v3319_v10, -inf  ;;  %v954_v8 = vsel %vm949_vm6, %v3327_v12, -inf  ;;  %v959_v15 = vmax.f32 %v952_v17, %v958_v27 }
 0x153   : > { %2659 = vmatmul.msk.bf16.gmra.mxu0 %vm682_vm5, %v2778_v3  ;;  %v928_v3 = vpop.f32.mrf.mxu1  ;;  %v3430_v27 = vadd.f32 %v3228_v14, %v3184_v47 }
 0x154   : > { %v1031_v18 = vmax.f32 %v1054_v23, %v1074_v59  ;;  %v3383_v34 = vadd.f32 %v3228_v14, %v928_v3  ;;  %v955_v59 = vmax.f32 %v950_v41, %v954_v8  ;;  %v3393_v23 = vadd.f32 %v3228_v14, %v3163_v33 }
 0x155   : > { %v3401_v3 = vadd.f32 %v3228_v14, %v3181_v44  ;;  %v964_v33 = vsel %vm949_vm6, %v3372_v31, -inf  ;;  %4515 = vst [vmem:[#allocation36_spill] sm:$0xff] %v3430_v27 }
 0x156   : > { %4508 = vst [vmem:[#allocation29_spill] sm:$0xff] %v3383_v34  ;;  %v963_v41 = vmax.f32 %v955_v59, %v962_v50  ;;  %v1039_v8 = vmax.f32 %v1031_v18, %v1056_v43  ;;  %v1058_v44 = vsel %vm949_vm6, %v3383_v34, -inf  ;;  %v3422_v50 = vsel %vm949_vm6, %v3393_v23, -inf }
 0x157   : > { %4509 = vst [vmem:[#allocation30_spill] sm:$0xff] %v3393_v23  ;;  %v3426_v18 = vadd.f32 %v3228_v14, %v3172_v38  ;;  %v986_v43 = vsel %vm949_vm6, %v3405_v16, -inf  ;;  %v965_v38 = vmax.f32 %v957_v0, %v964_v33  ;;  %v3449_v34 = vadd.f32 %v3228_v14, %v3209_v1 }
 0x158   : > { %v3215_v5 = vpop.f32.mrf.mxu0  ;;  %4510 = vst [vmem:[#allocation31_spill] sm:$0xff] %v3401_v3  ;;  %v971_v17 = vmax.f32 %v963_v41, %v970_v29  ;;  %v1047_v41 = vmax.f32 %v1039_v8, %v1058_v44 }
 0x159   : > { %4514 = vst [vmem:[#allocation35_spill] sm:$0xff] %v3426_v18  ;;  %v966_v0 = vsel %vm949_vm6, %v3426_v18, -inf }
 0x15a   : > { %v979_v29 = vmax.f32 %v971_v17, %v978_v35  ;;  %4519 = vst [vmem:[#allocation40_spill] sm:$0xff] %v3449_v34 }
 0x15b   : > { %v930_v61 = vpop.f32.mrf.mxu1 }
 0x15c   : > { %v3418_v63 = vadd.f32 %v3228_v14, %v930_v61  ;;  %v3436_v61 = vadd.f32 %v3228_v14, %v3195_v55  ;;  %v987_v8 = vmax.f32 %v979_v29, %v986_v43 }
 0x15e   : > { %4513 = vst [vmem:[#allocation34_spill] sm:$0xff] %v3418_v63  ;;  %v980_v35 = vsel %vm949_vm6, %v3436_v61, -inf }
 0x15f   : > { %4516 = vst [vmem:[#allocation37_spill] sm:$0xff] %v3436_v61 }
 0x160   : > { %v3217_v7 = vpop.f32.mrf.mxu0 }
 0x161   : > { %v3413_v26 = vadd.f32 %v3228_v14, %v3217_v7  ;;  %v972_v7 = vsel %vm949_vm6, %v3401_v3, -inf }
 0x162   : > { %v973_v33 = vmax.f32 %v965_v38, %v972_v7  ;;  %v3476_v7 = vadd.f32 %v3228_v14, %v3200_v58  ;;  %v967_v58 = vmax.f32 %v959_v15, %v966_v0 }
 0x163   : > { %v933_v6 = vpop.f32.mrf.mxu1  ;;  %4512 = vst [vmem:[#allocation33_spill] sm:$0xff] %v3413_v26  ;;  %v994_v55 = vsel %vm949_vm6, %v3413_v26, -inf }
 0x164   : > { %v3445_v47 = vadd.f32 %v3228_v14, %v933_v6  ;;  %v974_v6 = vsel %vm949_vm6, %v3430_v27, -inf  ;;  %4522 = vst [vmem:[#allocation43_spill] sm:$0xff] %v3476_v7  ;;  %v995_v38 = vmax.f32 %v987_v8, %v994_v55  ;;  %v981_v55 = vmax.f32 %v973_v33, %v980_v35 }
 0x165   : > { %v982_v35 = vsel %vm949_vm6, %v3476_v7, -inf }
 0x166   : > { %4518 = vst [vmem:[#allocation39_spill] sm:$0xff] %v3445_v47  ;;  %v1062_v29 = vsel %vm949_vm6, %v3445_v47, -inf  ;;  %v3498_v47 = vadd.f32 %v3228_v14, %v3175_v40 }
 0x168   : > { %v3219_v9 = vpop.f32.mrf.mxu0  ;;  %4526 = vst [vmem:[#allocation47_spill] sm:$0xff] %v3498_v47 }
 0x169   : > { %v3467_v44 = vadd.f32 %v3228_v14, %v3219_v9 }
 0x16b   : > { %v3337_v25 = vpop.f32.mrf.mxu1  ;;  %4521 = vst [vmem:[#allocation42_spill] sm:$0xff] %v3467_v44 }
 0x16c   : > { %v3490_v61 = vadd.f32 %v3228_v14, %v3337_v25  ;;  %v975_v25 = vmax.f32 %v967_v58, %v974_v6 }
 0x16e   : > { %4524 = vst [vmem:[#allocation45_spill] sm:$0xff] %v3490_v61 }
 0x170   : > { %v3221_v11 = vpop.f32.mrf.mxu0 }
 0x171   : > { %v3512_v40 = vadd.f32 %v3228_v14, %v3221_v11 }
 0x173   : > { %v938_v28 = vpop.f32.mrf.mxu1  ;;  %4528 = vst [vmem:[#allocation49_spill] sm:$0xff] %v3512_v40 }
 0x174   : > { %v3531_v58 = vadd.f32 %v3228_v14, %v938_v28 }
 0x176   : > { %4531 = vst [vmem:[#allocation52_spill] sm:$0xff] %v3531_v58 }
 0x178   : > { %v3223_v13 = vpop.f32.mrf.mxu0 }
 0x17b   : > { %v940_v8 = vpop.f32.mrf.mxu1 }
 0x180   : > { %v3243_v20 = vpop.f32.mrf.mxu0 }
 0x181   : > { %v3442_v59 = vadd.f32 %v3228_v14, %v3243_v20  ;;  %v1060_v20 = vsel %vm949_vm6, %v3418_v63, -inf  ;;  %v988_v63 = vsel %vm949_vm6, %v3449_v34, -inf }
 0x182   : > { %v1055_v43 = vmax.f32 %v1047_v41, %v1060_v20  ;;  %v3494_v41 = vadd.f32 %v3228_v14, %v3212_v4  ;;  %v989_v0 = vmax.f32 %v981_v55, %v988_v63 }
 0x183   : > { %4517 = vst [vmem:[#allocation38_spill] sm:$0xff] %v3442_v59 }
 0x184   : > { %4525 = vst [vmem:[#allocation46_spill] sm:$0xff] %v3494_v41  ;;  %v1063_v33 = vmax.f32 %v1055_v43, %v1062_v29  ;;  %v990_v63 = vsel %vm949_vm6, %v3494_v41, -inf }
 0x188   : > { %v3255_v39 = vpop.f32.mrf.mxu0 }
 0x189   : > { %v3484_v9 = vadd.f32 %v3228_v14, %v3255_v39  ;;  %v996_v39 = vsel %vm949_vm6, %v3467_v44, -inf }
 0x18a   : > { %v997_v6 = vmax.f32 %v989_v0, %v996_v39  ;;  %v3540_v0 = vadd.f32 %v3228_v14, %v3203_v60 }
 0x18b   : > { %4523 = vst [vmem:[#allocation44_spill] sm:$0xff] %v3484_v9 }
 0x18c   : > { %4533 = vst [vmem:[#allocation54_spill] sm:$0xff] %v3540_v0 }
 0x190   : > { %v3267_v56 = vpop.f32.mrf.mxu0 }
 0x191   : > { %v3526_v11 = vadd.f32 %v3228_v14, %v3267_v56  ;;  %v998_v56 = vsel %vm949_vm6, %v3512_v40, -inf }
 0x193   : > { %4530 = vst [vmem:[#allocation51_spill] sm:$0xff] %v3526_v11 }
 0x198   : > { %v3279_v24 = vpop.f32.mrf.mxu0 }
 0x1a0   : > { %v3291_v51 = vpop.f32.mrf.mxu0 }
 0x1a1   : > { %v3455_v19 = vadd.f32 %v3228_v14, %v3291_v51  ;;  %v1002_v51 = vsel %vm949_vm6, %v3442_v59, -inf }
 0x1a2   : > { %v1003_v20 = vmax.f32 %v995_v38, %v1002_v51  ;;  %v1004_v51 = vsel %vm949_vm6, %v3484_v9, -inf  ;;  %v3520_v38 = vadd.f32 %v3228_v14, %v3187_v49  ;;  %v968_v49 = vsel %vm949_vm6, %v3498_v47, -inf }
 0x1a3   : > { %4520 = vst [vmem:[#allocation41_spill] sm:$0xff] %v3455_v19  ;;  %v1005_v39 = vmax.f32 %v997_v6, %v1004_v51  ;;  %v3556_v51 = vadd.f32 %v3228_v14, %v3215_v5 }
 0x1a4   : > { %4529 = vst [vmem:[#allocation50_spill] sm:$0xff] %v3520_v38  ;;  %v976_v60 = vsel %vm949_vm6, %v3520_v38, -inf }
 0x1a5   : > { %4535 = vst [vmem:[#allocation56_spill] sm:$0xff] %v3556_v51 }
 0x1a8   : > { %v3303_v54 = vpop.f32.mrf.mxu0 }
 0x1b0   : > { %v3315_v48 = vpop.f32.mrf.mxu0 }
 0x1b1   : > { %v3546_v28 = vadd.f32 %v3228_v14, %v3315_v48  ;;  %v1006_v48 = vsel %vm949_vm6, %v3526_v11, -inf }
 0x1b3   : > { %4534 = vst [vmem:[#allocation55_spill] sm:$0xff] %v3546_v28  ;;  %v1014_v5 = vsel %vm949_vm6, %v3546_v28, -inf }
 0x1b8   : > { %v3395_v53 = vpop.f32.mrf.mxu0 }
 0x1c0   : > { %v878_v1 = vpop.f32.mrf.mxu0 }
 0x1c1   : > { %v3472_v17 = vadd.f32 %v3228_v14, %v878_v1  ;;  %v1010_v1 = vsel %vm949_vm6, %v3455_v19, -inf  ;;  %v3504_v19 = vadd.f32 %v3228_v14, %v3303_v54  ;;  %v1064_v54 = vsel %vm949_vm6, %v3490_v61, -inf }
 0x1c2   : > { %v1011_v4 = vmax.f32 %v1003_v20, %v1010_v1  ;;  %v983_v20 = vmax.f32 %v975_v25, %v982_v35 }
 0x1c3   : > { %4527 = vst [vmem:[#allocation48_spill] sm:$0xff] %v3504_v19  ;;  %v1018_v15 = vsel %vm949_vm6, %v3472_v17, -inf  ;;  %v1012_v1 = vsel %vm949_vm6, %v3504_v19, -inf }
 0x1c4   : > { %v1019_v43 = vmax.f32 %v1011_v4, %v1018_v15  ;;  %v1071_v15 = vmax.f32 %v1063_v33, %v1064_v54  ;;  %v991_v25 = vmax.f32 %v983_v20, %v990_v63  ;;  %v1013_v35 = vmax.f32 %v1005_v39, %v1012_v1 }
 0x1c5   : > { %v1066_v54 = vsel %vm949_vm6, %v3531_v58, -inf  ;;  %v3566_v63 = vadd.f32 %v3228_v14, %v3223_v13 }
 0x1c6   : > { %v1033_v33 = vmax.f32 %v1019_v43, %v1071_v15  ;;  %v999_v61 = vmax.f32 %v991_v25, %v998_v56  ;;  %v3574_v15 = vadd.f32 %v3228_v14, %v3279_v24  ;;  %v3577_v56 = vadd.f32 %v3228_v14, %v940_v8 }
 0x1c7   : > { %4536 = vst [vmem:[#allocation57_spill] sm:$0xff] %v3566_v63 }
 0x1c8   : > { %v880_v29 = vpop.f32.mrf.mxu0  ;;  %v1007_v1 = vmax.f32 %v999_v61, %v1006_v48  ;;  %v1041_v20 = vmax.f32 %v1033_v33, %v1066_v54  ;;  %4537 = vst [vmem:[#allocation58_spill] sm:$0xff] %v3574_v15  ;;  %v1000_v61 = vsel %vm949_vm6, %v3566_v63, -inf  ;;  %v1008_v8 = vsel %vm949_vm6, %v3574_v15, -inf }
 0x1c9   : > { %v3534_v55 = vadd.f32 %v3228_v14, %v880_v29  ;;  %v961_v29 = vmax.f32 %v3389_v36, %v3422_v50  ;;  %v943_v36 = vpop.f32.mrf.mxu1  ;;  %v984_v50 = vsel %vm949_vm6, %v3540_v0, -inf  ;;  %4538 = vst [vmem:[#allocation59_spill] sm:$0xff] %v3577_v56  ;;  %v1068_v48 = vsel %vm949_vm6, %v3577_v56, -inf }
 0x1cb   : > { %4532 = vst [vmem:[#allocation53_spill] sm:$0xff] %v3534_v55  ;;  %v1020_v4 = vsel %vm949_vm6, %v3534_v55, -inf  ;;  %v969_v6 = vmax.f32 %v961_v29, %v968_v49  ;;  %v992_v49 = vsel %vm949_vm6, %v3556_v51, -inf  ;;  %v1015_v29 = vmax.f32 %v1007_v1, %v1014_v5 }
 0x1cc   : > { %v1021_v55 = vmax.f32 %v1013_v35, %v1020_v4  ;;  %v3586_v35 = vadd.f32 %v3228_v14, %v3395_v53 }
 0x1cd   : > { %v977_v43 = vmax.f32 %v969_v6, %v976_v60 }
 0x1ce   : > { %v1049_v25 = vmax.f32 %v1041_v20, %v1021_v55  ;;  %4539 = vst [vmem:[#allocation60_spill] sm:$0xff] %v3586_v35  ;;  %v3595_v55 = vadd.f32 %v3228_v14, %v943_v36  ;;  %v1016_v53 = vsel %vm949_vm6, %v3586_v35, -inf }
 0x1cf   : > { %v985_v4 = vmax.f32 %v977_v43, %v984_v50 }
 0x1d0   : > { %v883_v39 = vpop.f32.mrf.mxu0  ;;  %4540 = vst [vmem:[#allocation61_spill] sm:$0xff] %v3595_v55  ;;  %v1057_v6 = vmax.f32 %v1049_v25, %v1068_v48  ;;  %v1070_v20 = vsel %vm949_vm6, %v3595_v55, -inf }
 0x1d1   : > { %v3580_v13 = vadd.f32 %v3228_v14, %v883_v39  ;;  %v993_v33 = vmax.f32 %v985_v4, %v992_v49  ;;  %v945_v1 = vpop.f32.mrf.mxu1 }
 0x1d2   : > { %v3607_v4 = vadd.f32 %v3228_v14, %v945_v1 }
 0x1d3   : > { %v1022_v24 = vsel %vm949_vm6, %v3580_v13, -inf  ;;  %v1001_v54 = vmax.f32 %v993_v33, %v1000_v61 }
 0x1d4   : > { %v1023_v60 = vmax.f32 %v1015_v29, %v1022_v24  ;;  %4541 = vst [vmem:[#allocation62_spill] sm:$0xff] %v3607_v4  ;;  %v1072_v24 = vsel %vm949_vm6, %v3607_v4, -inf }
 0x1d5   : > { %v1009_v50 = vmax.f32 %v1001_v54, %v1008_v8 }
 0x1d6   : > { %v1065_v5 = vmax.f32 %v1057_v6, %v1023_v60 }
 0x1d7   : > { %v1017_v49 = vmax.f32 %v1009_v50, %v1016_v53 }
 0x1d8   : > { %v885_v43 = vpop.f32.mrf.mxu0  ;;  %v1073_v29 = vmax.f32 %v1065_v5, %v1070_v20 }
 0x1d9   : > { %v3602_v39 = vadd.f32 %v3228_v14, %v885_v43  ;;  %v3611_v43 = vld [vmem:[#allocation2] sm:$0x1] }
 0x1db   : > { %v1024_v36 = vsel %vm949_vm6, %v3602_v39, -inf }
 0x1dc   : > { %v1025_v25 = vmax.f32 %v1017_v49, %v1024_v36 }
 0x1de   : > { %v1075_v61 = vmax.f32 %v1025_v25, %v1073_v29 }
 0x1e0   : > { %v1076_v33 = vmax.f32 %v1072_v24, %v1075_v61 }
 0x1e2   : > { %v1077_v60 = vrot.slane %v1076_v33, 4 }
 0x1e4   : > { %v1078_v8 = vmax.f32 %v1076_v33, %v1077_v60 }
 0x1e6   : > { %v1079_v48 = vrot.slane %v1078_v8, 2 }
 0x1e8   : > { %v1080_v54 = vmax.f32 %v1078_v8, %v1079_v48 }
 0x1ea   : > { %v1081_v6 = vrot.slane %v1080_v54, 1 }
 0x1ec   : > { %v1082_v53 = vmax.f32 %v1080_v54, %v1081_v6 }
 0x1ee   : > { %v3614_v50 = vmax.f32 %v3611_v43, %v1082_v53 }
 0x1f0   : > { %2260 = vst.msk [vmem:[#allocation2] sm:$0x1] %vm2259_vm7, %v3614_v50  ;;  %v3618_v14 = vperm.slane %v3614_v50, 0  ;;  %vm1416_vm7 = vcmask 25600  }
 0x1f2   : > { %v1153_v5 = vsub.f32 %v3607_v4, %v3618_v14  ;;  %v1090_v1 = vsub.f32 %v3319_v10, %v3618_v14  ;;  %v1091_v20 = vsub.f32 %v3323_v57, %v3618_v14  ;;  %v1104_v49 = vsub.f32 %v3430_v27, %v3618_v14 }
 0x1f3   : > { %v1105_v29 = vsub.f32 %v3520_v38, %v3618_v14  ;;  %v1092_v25 = vsub.f32 %v3350_v30, %v3618_v14  ;;  %v1093_v24 = vsub.f32 %v3354_v32, %v3618_v14  ;;  %v1102_v60 = vsub.f32 %v3364_v42, %v3618_v14 }
 0x1f4   : > { %v1280_v36 = vmul.f32 1.442695, %v1153_v5  ;;  %v1154_v61 = vmul.f32 1.442695, %v1090_v1  ;;  %v1156_v33 = vmul.f32 1.442695, %v1091_v20  ;;  %v1103_v48 = vsub.f32 %v3401_v3, %v3618_v14 }
 0x1f5   : > { %v1182_v8 = vmul.f32 1.442695, %v1104_v49  ;;  %v1184_v54 = vmul.f32 1.442695, %v1105_v29  ;;  %v1098_v6 = vsub.f32 %v3341_v22, %v3618_v14  ;;  %v1158_v53 = vmul.f32 1.442695, %v1092_v25 }
 0x1f6   : > { %2823 = vpow2.f32 %v1280_v36  ;;  %v1099_v5 = vsub.f32 %v3372_v31, %v3618_v14  ;;  %v1160_v1 = vmul.f32 1.442695, %v1093_v24  ;;  %v1100_v20 = vsub.f32 %v3426_v18, %v3618_v14 }
 0x1f7   : > { %2825 = vpow2.f32 %v1154_v61  ;;  %v1178_v4 = vmul.f32 1.442695, %v1102_v60  ;;  %v1101_v49 = vsub.f32 %v3498_v47, %v3618_v14  ;;  %v1180_v36 = vmul.f32 1.442695, %v1103_v48 }
 0x1f8   : > { %2827 = vpow2.f32 %v1156_v33  ;;  %v1120_v29 = vsub.f32 %v3526_v11, %v3618_v14  ;;  %v1170_v25 = vmul.f32 1.442695, %v1098_v6  ;;  %v1121_v24 = vsub.f32 %v3574_v15, %v3618_v14 }
 0x1f9   : > { %2829 = vpow2.f32 %v1182_v8  ;;  %v1172_v33 = vmul.f32 1.442695, %v1099_v5  ;;  %v1118_v60 = vsub.f32 %v3442_v59, %v3618_v14  ;;  %v1174_v8 = vmul.f32 1.442695, %v1100_v20 }
 0x1fa   : > { %2831 = vpow2.f32 %v1184_v54  ;;  %v1119_v6 = vsub.f32 %v3484_v9, %v3618_v14  ;;  %v1096_v5 = vsub.f32 %v3335_v21, %v3618_v14  ;;  %v1216_v20 = vmul.f32 1.442695, %v1121_v24 }
 0x1fb   : > { %2833 = vpow2.f32 %v1158_v53  ;;  %v1176_v53 = vmul.f32 1.442695, %v1101_v49  ;;  %v1116_v59 = vsub.f32 %v3512_v40, %v3618_v14  ;;  %v1210_v49 = vmul.f32 1.442695, %v1118_v60 }
 0x1fc   : > { %v3648_v61 = vpop.eup %2823  ;;  %2835 = vpow2.f32 %v1160_v1  ;;  %v1214_v1 = vmul.f32 1.442695, %v1120_v29  ;;  %v1117_v9 = vsub.f32 %v3566_v63, %v3618_v14  ;;  %v1212_v29 = vmul.f32 1.442695, %v1119_v6 }
 0x1fd   : > { %v3652_v38 = vpop.eup %2825  ;;  %2837 = vpow2.f32 %v1178_v4  ;;  %v1097_v4 = vsub.f32 %v3393_v23, %v3618_v14  ;;  %v1094_v27 = vsub.f32 %v3327_v12, %v3618_v14  ;;  %v1114_v63 = vsub.f32 %v3413_v26, %v3618_v14 }
 0x1fe   : > { %v3658_v54 = vpop.eup %2827  ;;  %2839 = vpow2.f32 %v1180_v36  ;;  %v1128_v18 = vsub.f32 %v3580_v13, %v3618_v14 }
 0x1ff   : > { %v2830_v11 = vpop.eup %2829  ;;  %2841 = vpow2.f32 %v1170_v25  ;;  %v1168_v60 = vmul.f32 1.442695, %v1097_v4  ;;  %v1162_v4 = vmul.f32 1.442695, %v1094_v27  ;;  %v1113_v27 = vsub.f32 %v3556_v51, %v3618_v14 }
 0x200   : > { %v2832_v15 = vpop.eup %2831  ;;  %2843 = vpow2.f32 %v1172_v33  ;;  %v1166_v33 = vmul.f32 1.442695, %v1096_v5  ;;  %v1115_v5 = vsub.f32 %v3467_v44, %v3618_v14  ;;  %v1112_v44 = vsub.f32 %v3494_v41, %v3618_v14 }
 0x201   : > { %v3666_v48 = vpop.eup %2833  ;;  %2845 = vpow2.f32 %v1174_v8  ;;  %v3676_v24 = vpack.c.bf16 %v2832_v15, %v2830_v11  ;;  %v1095_v8 = vsub.f32 %v3331_v2, %v3618_v14  ;;  %v1208_v11 = vmul.f32 1.442695, %v1117_v9 }
 0x202   : > { %v3670_v36 = vpop.eup %2835  ;;  %2847 = vpow2.f32 %v1176_v53  ;;  %v1206_v53 = vmul.f32 1.442695, %v1116_v59  ;;  %v1111_v59 = vsub.f32 %v3449_v34, %v3618_v14  ;;  %v1202_v9 = vmul.f32 1.442695, %v1114_v63 }
 0x203   : > { %v2838_v25 = vpop.eup %2837  ;;  %2849 = vpow2.f32 %v1214_v1  ;;  %1357 = vmatpush.bf16.msrb.mxu1 %v3676_v24  ;;  %v1110_v1 = vsub.f32 %v3405_v16, %v3618_v14  ;;  %v1134_v51 = vsub.f32 %v3253_v37, %v3618_v14  ;;  %v4545_v37 = vld [vmem:[#allocation41_spill] sm:$0xff]  ;;  %v3798_v21 = vpack.c.bf16 %v3658_v54, %v3652_v38 }
 0x204   : > { %v2840_v42 = vpop.eup %2839  ;;  %2851 = vpow2.f32 %v1216_v20  ;;  %v1196_v34 = vmul.f32 1.442695, %v1111_v59  ;;  %v4558_v54 = vld [vmem:[#allocation45_spill] sm:$0xff] }
 0x205   : > { %v2842_v40 = vpop.eup %2841  ;;  %2853 = vpow2.f32 %v1210_v49  ;;  %v3687_v20 = vpack.c.bf16 %v2840_v42, %v2838_v25  ;;  %v1164_v49 = vmul.f32 1.442695, %v1095_v8  ;;  %v1136_v42 = vsub.f32 %v3265_v52, %v3618_v14 }
 0x206   : > { %v2844_v6 = vpop.eup %2843  ;;  %2855 = vpow2.f32 %v1212_v29  ;;  %v1204_v25 = vmul.f32 1.442695, %v1115_v5  ;;  %v1194_v8 = vmul.f32 1.442695, %v1110_v1  ;;  %v1198_v52 = vmul.f32 1.442695, %v1112_v44 }
 0x207   : > { %v2846_v15 = vpop.eup %2845  ;;  %2857 = vpow2.f32 %v1166_v33  ;;  %1358 = vmatpush.bf16.msrb.mxu1 %v3687_v20  ;;  %v1135_v5 = vsub.f32 %v3260_v46, %v3618_v14  ;;  %v1246_v1 = vmul.f32 1.442695, %v1136_v42  ;;  %v3714_v44 = vpack.c.bf16 %v2844_v6, %v2842_v40  ;;  %v4543_v6 = vld [vmem:[#allocation37_spill] sm:$0xff] }
 0x208   : > { %v2848_v3 = vpop.eup %2847  ;;  %2859 = vpow2.f32 %v1168_v60  ;;  %v1107_v42 = vsub.f32 %v4543_v6, %v3618_v14 }
 0x209   : > { %v2850_v26 = vpop.eup %2849  ;;  %2861 = vpow2.f32 %v1206_v53  ;;  %v3700_v16 = vpack.c.bf16 %v2848_v3, %v2846_v15  ;;  %v1137_v53 = vsub.f32 %v3272_v62, %v3618_v14  ;;  %v1108_v3 = vsub.f32 %v3476_v7, %v3618_v14 }
 0x20a   : > { %v2852_v29 = vpop.eup %2851  ;;  %2863 = vpow2.f32 %v1208_v11  ;;  %v1200_v11 = vmul.f32 1.442695, %v1113_v27  ;;  %v1106_v7 = vsub.f32 %v3378_v45, %v3618_v14  ;;  %v4542_v27 = vld [vmem:[#allocation10_spill] sm:$0xff] }
 0x20b   : > { %v2854_v33 = vpop.eup %2853  ;;  %2865 = vpow2.f32 %v1162_v4  ;;  %v3698_v60 = vpack.c.bf16 %v2852_v29, %v2850_v26  ;;  %1359 = vmatpush.bf16.msrb.mxu1 %v3700_v16  ;;  %v1190_v45 = vmul.f32 1.442695, %v1108_v3  ;;  %v4546_v3 = vld [vmem:[#allocation8_spill] sm:$0xff] }
 0x20c   : > { %v2856_v63 = vpop.eup %2855  ;;  %2867 = vpow2.f32 %v1164_v49  ;;  %v1109_v49 = vsub.f32 %v3540_v0, %v3618_v14  ;;  %v1186_v62 = vmul.f32 1.442695, %v1106_v7 }
 0x20d   : > { %v2858_v41 = vpop.eup %2857  ;;  %2869 = vpow2.f32 %v1202_v9  ;;  %1371 = vmatpush.bf16.msra.mxu2 %v3698_v60  ;;  %v3712_v4 = vpack.c.bf16 %v2856_v63, %v2854_v33  ;;  %v1248_v9 = vmul.f32 1.442695, %v1137_v53  ;;  %v1244_v63 = vmul.f32 1.442695, %v1135_v5 }
 0x20e   : > { %v2860_v26 = vpop.eup %2859  ;;  %2871 = vpow2.f32 %v1204_v25  ;;  %v1132_v25 = vsub.f32 %v4542_v27, %v3618_v14  ;;  %v1192_v6 = vmul.f32 1.442695, %v1109_v49  ;;  %v1126_v5 = vsub.f32 %v3472_v17, %v3618_v14 }
 0x20f   : > { %v2862_v15 = vpop.eup %2861  ;;  %2873 = vpow2.f32 %v1194_v8  ;;  %v1242_v8 = vmul.f32 1.442695, %v1134_v51  ;;  %1360 = vmatpush.bf16.msrb.mxu1 %v3714_v44 }
 0x210   : > { %v2864_v59 = vpop.eup %2863  ;;  %2875 = vpow2.f32 %v1196_v34  ;;  %v4544_v34 = vld [vmem:[#allocation11_spill] sm:$0xff]  ;;  %v1226_v31 = vmul.f32 1.442695, %v1126_v5 }
 0x211   : > { %v2866_v29 = vpop.eup %2865  ;;  %2877 = vpow2.f32 %v1198_v52  ;;  %1372 = vmatpush.bf16.msra.mxu2 %v3712_v4  ;;  %v1133_v33 = vsub.f32 %v4544_v34, %v3618_v14  ;;  %v3728_v0 = vpack.c.bf16 %v2864_v59, %v2862_v15  ;;  %v3730_v52 = vpack.c.bf16 %v2860_v26, %v2858_v41 }
 0x212   : > { %v2868_v40 = vpop.eup %2867  ;;  %2879 = vpow2.f32 %v1200_v11  ;;  %v1130_v11 = vsub.f32 %v4546_v3, %v3618_v14  ;;  %v1238_v15 = vmul.f32 1.442695, %v1132_v25  ;;  %v1188_v26 = vmul.f32 1.442695, %v1107_v42 }
 0x213   : > { %v2870_v53 = vpop.eup %2869  ;;  %2881 = vpow2.f32 %v1246_v1  ;;  %1361 = vmatpush.bf16.msrb.mxu1 %v3730_v52  ;;  %v4547_v1 = vld [vmem:[#allocation9_spill] sm:$0xff]  ;;  %v1240_v49 = vmul.f32 1.442695, %v1133_v33  ;;  %v3748_v25 = vpack.c.bf16 %v2868_v40, %v2866_v29  ;;  %v1129_v33 = vsub.f32 %v3602_v39, %v3618_v14 }
 0x214   : > { %v2872_v51 = vpop.eup %2871  ;;  %2883 = vpow2.f32 %v1248_v9  ;;  %v1131_v59 = vsub.f32 %v4547_v1, %v3618_v14  ;;  %v1234_v7 = vmul.f32 1.442695, %v1130_v11  ;;  %v1150_v40 = vsub.f32 %v3531_v58, %v3618_v14  ;;  %v3771_v11 = vld [vmem:[%s419_s13] sm:$0xf] }
 0x215   : > { %v2874_v47 = vpop.eup %2873  ;;  %2885 = vpow2.f32 %v1242_v8  ;;  %1373 = vmatpush.bf16.msra.mxu2 %v3728_v0  ;;  %v3746_v46 = vpack.c.bf16 %v2872_v51, %v2870_v53  ;;  %v1152_v42 = vsub.f32 %v3595_v55, %v3618_v14 }
 0x216   : > { %v2876_v41 = vpop.eup %2875  ;;  %2887 = vpow2.f32 %v1244_v63  ;;  %v1274_v34 = vmul.f32 1.442695, %v1150_v40 }
 0x217   : > { %v2878_v9 = vpop.eup %2877  ;;  %2889 = vpow2.f32 %v1190_v45  ;;  %1362 = vmatpush.bf16.msrb.mxu1 %v3748_v25  ;;  %v1315_v45 = vlaneseq }
 0x218   : > { %v2880_v8 = vpop.eup %2879  ;;  %2891 = vpow2.f32 %v1192_v6  ;;  %v1236_v6 = vmul.f32 1.442695, %v1131_v59  ;;  %v3777_v59 = vpack.c.bf16 %v3670_v36, %v3666_v48  ;;  %v1232_v36 = vmul.f32 1.442695, %v1129_v33 }
 0x219   : > { %v2882_v22 = vpop.eup %2881  ;;  %2893 = vpow2.f32 %v1238_v15  ;;  %1374 = vmatpush.bf16.msra.mxu2 %v3746_v46  ;;  %v3764_v51 = vpack.c.bf16 %v2880_v8, %v2878_v9  ;;  %v3773_v15 = vshrl.u32 %v1315_v45, 7  ;;  %v1151_v8 = vsub.f32 %v3577_v56, %v3618_v14 }
 0x21a   : > { %v2884_v29 = vpop.eup %2883  ;;  %2895 = vpow2.f32 %v1240_v49  ;;  %v4548_v49 = vld [vmem:[#allocation53_spill] sm:$0xff]  ;;  %v1278_v56 = vmul.f32 1.442695, %v1152_v42  ;;  %v4550_v33 = vmov 0 }
 0x21b   : > { %v2886_v63 = vpop.eup %2885  ;;  %2897 = vpow2.f32 %v1186_v62  ;;  %v3762_v53 = vpack.c.bf16 %v2884_v29, %v2882_v22  ;;  %v1318_v62 = vperm.slane %v3771_v11, 0  ;;  %v1127_v9 = vsub.f32 %v4548_v49, %v3618_v14  ;;  %1363 = vmatpush.bf16.msrb.mxu1 %v3777_v59 }
 0x21c   : > { %v2888_v58 = vpop.eup %2887  ;;  %2899 = vpow2.f32 %v1188_v26  ;;  %v1230_v29 = vmul.f32 1.442695, %v1128_v18  ;;  %v4549_v26 = vld [vmem:[#allocation39_spill] sm:$0xff]  ;;  %v3790_v45 = vadd.s32 8, %v3773_v15  ;;  %v1276_v40 = vmul.f32 1.442695, %v1151_v8 }
 0x21d   : > { %v2890_v22 = vpop.eup %2889  ;;  %2901 = vpow2.f32 %v1234_v7  ;;  %1385 = vmatpush.bf16.msra.mxu3 %v3762_v53  ;;  %1375 = vmatpush.bf16.msra.mxu2 %v3764_v51  ;;  %v1148_v48 = vsub.f32 %v4549_v26, %v3618_v14  ;;  %v3792_v18 = vpack.c.bf16 %v2888_v58, %v2886_v63  ;;  %v3794_v7 = vpack.c.bf16 %v2876_v41, %v2874_v47  ;;  %v3813_v47 = vld [vmem:[%s4399_s7] sm:$0xf] }
 0x21e   : > { %v2892_v5 = vpop.eup %2891  ;;  %2903 = vpow2.f32 %v1236_v6  ;;  %vm3801_vm8 = vcmp.eq.s32.totalorder %v3773_v15, %v1318_v62  ;;  %vm3806_vm9 = vcmp.eq.s32.totalorder %v3790_v45, %v1318_v62  ;;  %v4553_v6 = vmov 0  ;;  %4556 = vst [vmem:[#allocation63_spill] sm:$0xff] %v3813_v47  ;;  %v4557_v58 = vld [vmem:[#allocation29_spill] sm:$0xff] }
 0x21f   : > { %v2894_v55 = vpop.eup %2893  ;;  %2905 = vpow2.f32 %v1226_v31  ;;  %v4551_v33 = vsel %vm3801_vm8, 4294967295, %v4550_v33  ;;  %v4554_v6 = vsel %vm3806_vm9, 4294967295, %v4553_v6  ;;  %v1146_v38 = vsub.f32 %v4557_v58, %v3618_v14  ;;  %1364 = vmatpush.bf16.msrb.mxu1 %v3798_v21  ;;  %vm2680_vm10 = vmpackc.low %vm3806_vm9, %vm3801_vm8 }
 0x220   : > { %v2896_v27 = vpop.eup %2895  ;;  %4552 = vst [vmem:[#allocation8_spill] sm:$0xff] %v4551_v33  ;;  %v1149_v41 = vsub.f32 %v4558_v54, %v3618_v14  ;;  %2907 = vpow2.f32 %v1230_v29  ;;  %v4559_v63 = vsub.f32 %v3546_v28, %v3618_v14  ;;  %v1228_v26 = vmul.f32 1.442695, %v1127_v9  ;;  %v4570_v33 = vld [vmem:[#allocation25_spill] sm:$0xff] }
 0x221   : > { %4555 = vst [vmem:[#allocation53_spill] sm:$0xff] %v4554_v6  ;;  %v2898_v31 = vpop.eup %2897  ;;  %1386 = vmatpush.bf16.msra.mxu3 %v3792_v18  ;;  %1376 = vmatpush.bf16.msra.mxu2 %v3794_v7  ;;  %2909 = vpow2.f32 %v1232_v36  ;;  %v1319_v58 = vperm.slane %v3771_v11, 1  ;;  %v3826_v54 = vpack.c.bf16 %v2896_v27, %v2894_v55  ;;  %v3828_v8 = vpack.c.bf16 %v2892_v5, %v2890_v22  ;;  %v4560_v36 = vld [vmem:[#allocation34_spill] sm:$0xff] }
 0x222   : > { %v2900_v42 = vpop.eup %2899  ;;  %v1222_v62 = vmul.f32 1.442695, %v4559_v63  ;;  %2911 = vpow2.f32 %v1278_v56  ;;  %v437_v29 = vpack.c.bf16 %v3813_v47, %v3813_v47  ;;  %v1147_v63 = vsub.f32 %v4560_v36, %v3618_v14 }
 0x223   : > { %v2902_v23 = vpop.eup %2901  ;;  %v1270_v28 = vmul.f32 1.442695, %v1148_v48  ;;  %2913 = vpow2.f32 %v1274_v34  ;;  %v4561_v56 = vsub.f32 %v4545_v37, %v3618_v14  ;;  %v1272_v27 = vmul.f32 1.442695, %v1149_v41  ;;  %v4569_v37 = vld [vmem:[#allocation22_spill] sm:$0xff] }
 0x224   : > { %v2904_v9 = vpop.eup %2903  ;;  %2915 = vpow2.f32 %v1276_v40  ;;  %v4562_v5 = vsub.f32 %v3586_v35, %v3618_v14  ;;  %vm3847_vm12 = vcmp.eq.s32.totalorder %v3773_v15, %v1319_v58  ;;  %v4563_v34 = vmov 0 }
 0x225   : > { %v1218_v55 = vmul.f32 1.442695, %v4561_v56  ;;  %1387 = vmatpush.bf16.msra.mxu3 %v3826_v54  ;;  %1377 = vmatpush.bf16.msra.mxu2 %v3828_v8  ;;  %v2906_v22 = vpop.eup %2905  ;;  %2917 = vpow2.f32 %v1228_v26  ;;  %v4564_v34 = vsel %vm3847_vm12, 4294967295, %v4563_v34  ;;  %vm3852_vm13 = vcmp.eq.s32.totalorder %v3790_v45, %v1319_v58 }
 0x226   : > { %v1224_v47 = vmul.f32 1.442695, %v4562_v5  ;;  %4565 = vst [vmem:[#allocation64_spill] sm:$0xff] %v4564_v34  ;;  %v4566_v48 = vmov 0  ;;  %v4482_v41 = vmov 1.0|1.0   ;;  %v2908_v40 = vpop.eup %2907  ;;  %2919 = vpow2.f32 %v1222_v62  ;;  %vm2682_vm14 = vmpackc.low %vm3852_vm13, %vm3847_vm12 }
 0x227   : > { %v4567_v48 = vsel %vm3852_vm13, 4294967295, %v4566_v48  ;;  %2681 = vmatmul.msk.bf16.vlgmr.msrb.gmra.mxu1 %vm2680_vm10, %v4482_v41  ;;  %v3862_v26 = vpack.c.bf16 %v2904_v9, %v2902_v23  ;;  %v3864_v56 = vpack.c.bf16 %v2900_v42, %v2898_v31  ;;  %v3867_v5 = vsel %vm1514_vm11, %v437_v29, 0  ;;  %v2910_v58 = vpop.eup %2909  ;;  %v4572_v9 = vld [vmem:[#allocation20_spill] sm:$0xff] }
 0x228   : > { %4568 = vst [vmem:[#allocation65_spill] sm:$0xff] %v4567_v48  ;;  %v1144_v35 = vsub.f32 %v4569_v37, %v3618_v14  ;;  %v1266_v36 = vmul.f32 1.442695, %v1146_v38  ;;  %2921 = vpow2.f32 %v1270_v28  ;;  %v2912_v6 = vpop.eup %2911  ;;  %v1145_v1 = vsub.f32 %v4570_v33, %v3618_v14  ;;  %v4575_v48 = vld [vmem:[#allocation18_spill] sm:$0xff] }
 0x229   : > { %v1268_v41 = vmul.f32 1.442695, %v1147_v63  ;;  %2923 = vpow2.f32 %v1272_v27  ;;  %1388 = vmatpush.bf16.msra.mxu3 %v3862_v26  ;;  %1378 = vmatpush.bf16.msra.mxu2 %v3864_v56  ;;  %v2914_v23 = vpop.eup %2913  ;;  %v4571_v31 = vsub.f32 %v3504_v19, %v3618_v14  ;;  %v3883_v38 = vpack.c.bf16 %v3648_v61, %v2912_v6  ;;  %v4574_v6 = vld [vmem:[#allocation21_spill] sm:$0xff] }
 0x22a   : > { %2925 = vpow2.f32 %v1224_v47  ;;  %v2916_v42 = vpop.eup %2915  ;;  %v3886_v62 = vpack.c.bf16 %v2910_v58, %v2908_v40  ;;  %v1142_v63 = vsub.f32 %v4572_v9, %v3618_v14  ;;  %v1262_v27 = vmul.f32 1.442695, %v1144_v35 }
 0x22b   : > { %v1220_v28 = vmul.f32 1.442695, %v4571_v31  ;;  %2927 = vpow2.f32 %v1218_v55  ;;  %v2918_v29 = vpop.eup %2917  ;;  %1399 = vmatpush.bf16.msra.mxu1 %v3883_v38  ;;  %v4573_v19 = vmov 1.0|1.0   ;;  %v1143_v47 = vsub.f32 %v4574_v6, %v3618_v14 }
 0x22c   : > { %2929 = vpow2.f32 %v1266_v36  ;;  %2683 = vmatmul.msk.bf16.vlgmr.msra.gmra.mxu2 %vm2682_vm14, %v4573_v19  ;;  %v2920_v61 = vpop.eup %2919  ;;  %v1264_v55 = vmul.f32 1.442695, %v1145_v1  ;;  %v3900_v35 = vpack.c.bf16 %v2916_v42, %v2914_v23  ;;  %v1300_v58 = vpack.c.bf16 %v2918_v29, %v2906_v22  ;;  %v4576_v1 = vld [vmem:[#allocation19_spill] sm:$0xff] }
 0x22d   : > { %1525 = vmatpush.bf16.msrb.mxu2 %v3867_v5  ;;  %2931 = vpow2.f32 %v1268_v41  ;;  %1389 = vmatpush.bf16.msra.mxu3 %v3886_v62  ;;  %v1140_v34 = vsub.f32 %v4575_v48, %v3618_v14  ;;  %v1258_v33 = vmul.f32 1.442695, %v1142_v63  ;;  %v1141_v41 = vsub.f32 %v4576_v1, %v3618_v14  ;;  %v4577_v63 = vld [vmem:[#allocation16_spill] sm:$0xff] }
 0x22e   : > { %v2922_v40 = vpop.eup %2921  ;;  %2933 = vpow2.f32 %v1220_v28  ;;  %v1260_v9 = vmul.f32 1.442695, %v1143_v47  ;;  %v1320_v23 = vperm.slane %v3771_v11, 2  ;;  %v4578_v47 = vld [vmem:[#allocation17_spill] sm:$0xff]  ;;  %vm2225_vm8 = vcmask 1043456  }
 0x22f   : > { %v2924_v36 = vpop.eup %2923  ;;  %2935 = vpow2.f32 %v1262_v27  ;;  %1400 = vmatpush.bf16.msra.mxu1 %v3900_v35  ;;  %v1138_v27 = vsub.f32 %v4577_v63, %v3618_v14  ;;  %v1254_v48 = vmul.f32 1.442695, %v1140_v34  ;;  %v1256_v1 = vmul.f32 1.442695, %v1141_v41 }
 0x230   : > { %v2926_v31 = vpop.eup %2925  ;;  %2937 = vpow2.f32 %v1264_v55  ;;  %v3908_v42 = vpack.c.bf16 %v2924_v36, %v2922_v40  ;;  %v1139_v55 = vsub.f32 %v4578_v47, %v3618_v14  ;;  %vm3919_vm15 = vcmp.eq.s32.totalorder %v3773_v15, %v1320_v23 }
 0x231   : > { %v2928_v37 = vpop.eup %2927  ;;  %1390 = vmatpush.bf16.msra.mxu3 %v1300_v58  ;;  %v3910_v29 = vpack.c.bf16 %v2926_v31, %v2920_v61  ;;  %2939 = vpow2.f32 %v1258_v33  ;;  %vm3924_vm0 = vcmp.eq.s32.totalorder %v3790_v45, %v1320_v23  ;;  %v1250_v14 = vmul.f32 1.442695, %v1138_v27 }
 0x232   : > { %v2930_v28 = vpop.eup %2929  ;;  %2941 = vpow2.f32 %v1260_v9  ;;  %v1252_v9 = vmul.f32 1.442695, %v1139_v55  ;;  %vm2684_vm1 = vmpackc.low %vm3924_vm0, %vm3919_vm15  ;;  %v2250_v55 = vld [vmem:[#allocation4 + $0x8] sm:$0x3]  ;;  %vm2257_vm9 = vcmask 254976  }
 0x233   : > { %v2932_v22 = vpop.eup %2931  ;;  %1401 = vmatpush.bf16.msra.mxu1 %v3908_v42  ;;  %2943 = vpow2.f32 %v1254_v48 }
 0x234   : > { %v2934_v6 = vpop.eup %2933  ;;  %v3928_v33 = vpack.c.bf16 %v2932_v22, %v2930_v28  ;;  %2945 = vpow2.f32 %v1256_v1  ;;  %v1321_v1 = vperm.slane %v3771_v11, 3  ;;  %v4587_v11 = vsub.f32 %v3611_v43, %v3614_v50 }
 0x235   : > { %1391 = vmatpush.bf16.msra.mxu3 %v3910_v29  ;;  %v2936_v40 = vpop.eup %2935  ;;  %v3930_v31 = vpack.c.bf16 %v2934_v6, %v2928_v37  ;;  %2947 = vpow2.f32 %v1250_v14  ;;  %v1351_v14 = vld [vmem:[#allocation3 + $0x8] sm:$0x3] }
 0x236   : > { %v2938_v34 = vpop.eup %2937  ;;  %2949 = vpow2.f32 %v1252_v9  ;;  %vm3952_vm2 = vcmp.eq.s32.totalorder %v3773_v15, %v1321_v1  ;;  %vm3957_vm3 = vcmp.eq.s32.totalorder %v3790_v45, %v1321_v1  ;;  %v1085_v15 = vmul.f32 1.442695, %v4587_v11 }
 0x237   : > { %1402 = vmatpush.bf16.msra.mxu1 %v3928_v33  ;;  %v2940_v41 = vpop.eup %2939  ;;  %v3939_v28 = vpack.c.bf16 %v2938_v34, %v2936_v40  ;;  %vm2686_vm4 = vmpackc.low %vm3957_vm3, %vm3952_vm2 }
 0x238   : > { %v2942_v37 = vpop.eup %2941  ;;  %2951 = vpow2.f32 %v1085_v15 }
 0x239   : > { %1392 = vmatpush.bf16.msra.mxu3 %v3930_v31  ;;  %v2944_v48 = vpop.eup %2943  ;;  %v1308_v6 = vpack.c.bf16 %v2942_v37, %v2940_v41 }
 0x23b   : > { %1403 = vmatpush.bf16.msra.mxu1 %v3939_v28 }
 0x23c   : > { %2685 = vmatmul.msk.bf16.vlgmr.msra.gmra.mxu3 %vm2684_vm1, %v4573_v19  ;;  %2688 = vmatmul.msk.bf16.vlgmr.msrb.gmra.mxu2 %vm949_vm6, %v3798_v21 }
 0x23d   : > { %2799 = vmatpush.bf16.msrb.mxu3 %v3867_v5  ;;  %v2946_v5 = vpop.eup %2945 }
 0x23e   : > { %v2948_v23 = vpop.eup %2947  ;;  %v1307_v22 = vpack.c.bf16 %v2946_v5, %v2944_v48 }
 0x23f   : > { %1404 = vmatpush.bf16.msra.mxu1 %v1308_v6  ;;  %v2950_v27 = vpop.eup %2949 }
 0x240   : > { %v1306_v21 = vpack.c.bf16 %v2950_v27, %v2948_v23 }
 0x243   : > { %1405 = vmatpush.bf16.msra.mxu1 %v1307_v22 }
 0x247   : > { %1406 = vmatpush.bf16.msra.mxu1 %v1306_v21 }
 0x24a   : > { %2687 = vmatmul.msk.bf16.vlgmr.msra.gmra.mxu1 %vm2686_vm4, %v4573_v19 }
 0x24c   : > { %2706 = vmatmul.msk.bf16.vlgmr.msrb.gmra.mxu3 %vm949_vm6, %v1300_v58  ;;  %2689 = vmatmul.msk.bf16.gmra.mxu2 %vm949_vm6, %v3777_v59 }
 0x25c   : > { %2707 = vmatmul.msk.bf16.gmra.mxu3 %vm949_vm6, %v3886_v62  ;;  %2690 = vmatmul.msk.bf16.gmra.mxu2 %vm949_vm6, %v3748_v25 }
 0x26c   : > { %2708 = vmatmul.msk.bf16.gmra.mxu3 %vm949_vm6, %v3862_v26  ;;  %2691 = vmatmul.msk.bf16.gmra.mxu2 %vm949_vm6, %v3730_v52 }
 0x27c   : > { %2709 = vmatmul.msk.bf16.gmra.mxu3 %vm949_vm6, %v3826_v54  ;;  %2692 = vmatmul.msk.bf16.gmra.mxu2 %vm949_vm6, %v3714_v44 }
 0x28c   : > { %2710 = vmatmul.msk.bf16.gmra.mxu3 %vm949_vm6, %v3792_v18  ;;  %2693 = vmatmul.msk.bf16.gmra.mxu2 %vm949_vm6, %v3700_v16  ;;  %v1350_v18 = vld [vmem:[#allocation3] sm:$0xff] }
 0x29c   : > { %2711 = vmatmul.msk.bf16.gmra.mxu3 %vm949_vm6, %v3762_v53  ;;  %2694 = vmatmul.msk.bf16.gmra.mxu2 %vm949_vm6, %v3687_v20 }
 0x2a4   : > { %v1366_v25 = vpop.f32.mrf.mxu1 }
 0x2ac   : > { %2712 = vmatmul.msk.bf16.gmra.mxu3 %vm949_vm6, %v1306_v21  ;;  %2695 = vmatmul.msk.bf16.gmra.mxu2 %vm949_vm6, %v3676_v24  ;;  %v1368_v20 = vpop.f32.mrf.mxu1  ;;  %v4004_v24 = vpop.eup %2951 }
 0x2ad   : > { %v1353_v45 = vperm.slane %v4004_v24, 0 }
 0x2af   : > { %v1380_v52 = vpop.f32.mrf.mxu2  ;;  %v1355_v62 = vmul.f32 %v1353_v45, %v1350_v18  ;;  %v1356_v5 = vmul.f32 %v1353_v45, %v1351_v14 }
 0x2b0   : > { %v1381_v59 = vadd.f32 %v1380_v52, %v1366_v25 }
 0x2b7   : > { %v1382_v44 = vpop.f32.mrf.mxu2 }
 0x2bc   : > { %2713 = vmatmul.msk.bf16.gmra.mxu3 %vm949_vm6, %v1307_v22  ;;  %2696 = vmatmul.msk.bf16.gmra.mxu2 %vm949_vm6, %v3864_v56  ;;  %v1383_v56 = vadd.f32 %v1382_v44, %v1368_v20 }
 0x2bf   : > { %v1394_v16 = vpop.f32.mrf.mxu3  ;;  %v1527_v53 = vpop.f32.mrf.mxu2 }
 0x2c0   : > { %1751 = vrot.lane.b32.xlu0 %v1527_v53, %s3005_s26  ;;  %v1395_v43 = vadd.f32 %v1394_v16, %v1381_v59 }
 0x2c7   : > { %v1396_v50 = vpop.f32.mrf.mxu3  ;;  %v1408_v54 = vpop.f32.mrf.mxu1 }
 0x2c8   : > { %v1529_v26 = vpop.f32.mrf.mxu2  ;;  %v1409_v58 = vadd.f32 %v1408_v54, %v1395_v43  ;;  %v1397_v9 = vadd.f32 %v1396_v50, %v1383_v56 }
 0x2c9   : > { %1753 = vrot.lane.b32.xlu0 %v1529_v26, %s3005_s26 }
 0x2ca   : > { %v1413_v34 = vadd.f32 %v1409_v58, %v1355_v62 }
 0x2cc   : > { %2714 = vmatmul.msk.bf16.gmra.mxu3 %vm949_vm6, %v1308_v6  ;;  %1415 = vst.msk [vmem:[#allocation3] sm:$0xff] %vm949_vm6, %v1413_v34  ;;  %2697 = vmatmul.msk.bf16.gmra.mxu2 %vm949_vm6, %v3828_v8 }
 0x2cf   : > { %v1617_v41 = vpop.f32.mrf.mxu3  ;;  %v1410_v37 = vpop.f32.mrf.mxu1 }
 0x2d0   : > { %1823 = vrot.lane.b32.xlu1 %v1617_v41, %s3005_s26  ;;  %v1532_v48 = vpop.f32.mrf.mxu2  ;;  %v1411_v1 = vadd.f32 %v1410_v37, %v1397_v9 }
 0x2d2   : > { %v1414_v23 = vadd.f32 %v1411_v1, %v1356_v5 }
 0x2d4   : > { %1417 = vst.msk [vmem:[#allocation3 + $0x8] sm:$0x3] %vm1416_vm7, %v1414_v23 }
 0x2d7   : > { %v1619_v22 = vpop.f32.mrf.mxu3 }
 0x2d8   : > { %1825 = vrot.lane.b32.xlu2 %v1619_v22, %s3005_s26  ;;  %1755 = vrot.lane.b32.xlu1 %v1532_v48, %s3005_s26  ;;  %v1534_v6 = vpop.f32.mrf.mxu2 }
 0x2dc   : > { %2715 = vmatmul.msk.bf16.gmra.mxu3 %vm949_vm6, %v3939_v28  ;;  %2698 = vmatmul.msk.bf16.gmra.mxu2 %vm949_vm6, %v3794_v7 }
 0x2df   : > { %v1622_v8 = vpop.f32.mrf.mxu3 }
 0x2e0   : > { %1827 = vrot.lane.b32.xlu1 %v1622_v8, %s3005_s26  ;;  %1757 = vrot.lane.b32.xlu2 %v1534_v6, %s3005_s26  ;;  %v1537_v27 = vpop.f32.mrf.mxu2 }
 0x2e7   : > { %v1624_v21 = vpop.f32.mrf.mxu3 }
 0x2e8   : > { %1829 = vrot.lane.b32.xlu2 %v1624_v21, %s3005_s26  ;;  %1759 = vrot.lane.b32.xlu1 %v1537_v27, %s3005_s26  ;;  %v1539_v52 = vpop.f32.mrf.mxu2 }
 0x2ec   : > { %2716 = vmatmul.msk.bf16.gmra.mxu3 %vm949_vm6, %v3928_v33  ;;  %2699 = vmatmul.msk.bf16.gmra.mxu2 %vm949_vm6, %v3764_v51 }
 0x2ef   : > { %v1627_v28 = vpop.f32.mrf.mxu3 }
 0x2f0   : > { %1831 = vrot.lane.b32.xlu0 %v1627_v28, %s3005_s26  ;;  %1761 = vrot.lane.b32.xlu2 %v1539_v52, %s3005_s26  ;;  %v1542_v7 = vpop.f32.mrf.mxu2 }
 0x2f7   : > { %v1629_v25 = vpop.f32.mrf.mxu3 }
 0x2f8   : > { %1833 = vrot.lane.b32.xlu1 %v1629_v25, %s3005_s26  ;;  %v1544_v44 = vpop.f32.mrf.mxu2 }
 0x2fc   : > { %2717 = vmatmul.msk.bf16.gmra.mxu3 %vm949_vm6, %v3908_v42  ;;  %2700 = vmatmul.msk.bf16.gmra.mxu2 %vm949_vm6, %v3746_v46 }
 0x2ff   : > { %v1632_v33 = vpop.f32.mrf.mxu3 }
 0x300   : > { %1835 = vrot.lane.b32.xlu2 %v1632_v33, %s3005_s26  ;;  %1763 = vrot.lane.b32.xlu1 %v1542_v7, %s3005_s26  ;;  %v1547_v51 = vpop.f32.mrf.mxu2 }
 0x307   : > { %v1634_v11 = vpop.f32.mrf.mxu3 }
 0x308   : > { %1837 = vrot.lane.b32.xlu0 %v1634_v11, %s3005_s26  ;;  %1765 = vrot.lane.b32.xlu2 %v1544_v44, %s3005_s26  ;;  %v1549_v15 = vpop.f32.mrf.mxu2  ;;  %v4588_v11 = vld [vmem:[#allocation9_spill] sm:$0xff] }
 0x30c   : > { %2718 = vmatmul.msk.bf16.gmra.mxu3 %vm949_vm6, %v3900_v35  ;;  %2701 = vmatmul.msk.bf16.gmra.mxu2 %vm949_vm6, %v3728_v0 }
 0x30f   : > { %v1637_v42 = vpop.f32.mrf.mxu3 }
 0x310   : > { %1767 = vrot.lane.b32.xlu2 %v1547_v51, %s3005_s26  ;;  %1769 = vrot.lane.b32.xlu0 %v1549_v15, %s3005_s26  ;;  %v1552_v46 = vpop.f32.mrf.mxu2 }
 0x317   : > { %v1639_v16 = vpop.f32.mrf.mxu3 }
 0x318   : > { %1839 = vrot.lane.b32.xlu2 %v1637_v42, %s3005_s26  ;;  %1841 = vrot.lane.b32.xlu0 %v1639_v16, %s3005_s26  ;;  %v1554_v20 = vpop.f32.mrf.mxu2 }
 0x319   : > { %1773 = vrot.lane.b32.xlu1 %v1554_v20, %s3005_s26 }
 0x31c   : > { %2719 = vmatmul.msk.bf16.gmra.mxu3 %vm949_vm6, %v3883_v38  ;;  %2702 = vmatmul.msk.bf16.gmra.mxu2 %vm949_vm6, %v3712_v4 }
 0x31f   : > { %v1642_v0 = vpop.f32.mrf.mxu3 }
 0x320   : > { %1843 = vrot.lane.b32.xlu2 %v1642_v0, %s3005_s26  ;;  %1771 = vrot.lane.b32.xlu0 %v1552_v46, %s3005_s26  ;;  %v1557_v35 = vpop.f32.mrf.mxu2 }
 0x327   : > { %v1644_v53 = vpop.f32.mrf.mxu3 }
 0x328   : > { %1845 = vrot.lane.b32.xlu0 %v1644_v53, %s3005_s26  ;;  %1775 = vrot.lane.b32.xlu2 %v1557_v35, %s3005_s26  ;;  %v1559_v59 = vpop.f32.mrf.mxu2  ;;  %v4589_v35 = vld [vmem:[#allocation30_spill] sm:$0xff] }
 0x32c   : > { %2703 = vmatmul.msk.bf16.gmra.mxu2 %vm949_vm6, %v3698_v60 }
 0x32f   : > { %v4057_v45 = vpop.f32.mrf.mxu3 }
 0x330   : > { %1777 = vrot.lane.b32.xlu2 %v1559_v59, %s3005_s26  ;;  %v1562_v4 = vpop.f32.mrf.mxu2  ;;  %v4590_v59 = vld [vmem:[#allocation23_spill] sm:$0xff] }
 0x331   : > { %1779 = vrot.lane.b32.xlu1 %v1562_v4, %s3005_s26 }
 0x332   : > { %v1752_v38 = vpop.permute.xlu0 %1751  ;;  %v1826_v54 = vpop.permute.xlu2 %1825 }
 0x333   : > { %v4064_v26 = vmul.f32 %v1752_v38, %v3319_v10  ;;  %v4076_v14 = vmul.f32 %v1826_v54, %v4548_v49  ;;  %v4591_v54 = vld [vmem:[#allocation10_spill] sm:$0xff] }
 0x337   : > { %v4061_v18 = vpop.f32.mrf.mxu3 }
 0x338   : > { %v1564_v43 = vpop.f32.mrf.mxu2 }
 0x33b   : > { %v1754_v50 = vpop.permute.xlu0 %1753 }
 0x33c   : > { %v4067_v62 = vmul.f32 %v1754_v50, %v3323_v57  ;;  %2704 = vmatmul.msk.bf16.gmra.mxu2 %vm949_vm6, %v3930_v31  ;;  %v1758_v57 = vpop.permute.xlu2 %1757 }
 0x33d   : > { %v4086_v48 = vmul.f32 %v1758_v57, %v3354_v32 }
 0x33e   : > { %v2007_v60 = vpack.c.bf16 %v4067_v62, %v4064_v26  ;;  %v4615_v62 = vld [vmem:[#allocation40_spill] sm:$0xff] }
 0x33f   : > { %v1652_v58 = vpop.f32.mrf.mxu3 }
 0x340   : > { %1851 = vrot.lane.b32.xlu1 %v1652_v58, %s3005_s26  ;;  %v1567_v56 = vpop.f32.mrf.mxu2 }
 0x341   : > { %1783 = vrot.lane.b32.xlu0 %v1567_v56, %s3005_s26  ;;  %v4592_v56 = vld [vmem:[#allocation11_spill] sm:$0xff] }
 0x342   : > { %v1824_v34 = vpop.permute.xlu1 %1823 }
 0x343   : > { %v4079_v10 = vmul.f32 %v1824_v34, %v3472_v17 }
 0x344   : > { %v1830_v5 = vpop.permute.xlu2 %1829 }
 0x345   : > { %v2025_v31 = vpack.c.bf16 %v4076_v14, %v4079_v10  ;;  %v4097_v6 = vmul.f32 %v1830_v5, %v3602_v39 }
 0x347   : > { %v1654_v9 = vpop.f32.mrf.mxu3 }
 0x348   : > { %1853 = vrot.lane.b32.xlu2 %v1654_v9, %s3005_s26  ;;  %1781 = vrot.lane.b32.xlu1 %v1564_v43, %s3005_s26  ;;  %v1569_v41 = vpop.f32.mrf.mxu2 }
 0x34a   : > { %v1756_v37 = vpop.permute.xlu1 %1755 }
 0x34b   : > { %v4089_v49 = vmul.f32 %v1756_v37, %v3350_v30 }
 0x34c   : > { %2705 = vmatmul.msk.bf16.gmra.mxu2 %vm949_vm6, %v3910_v29  ;;  %v1762_v27 = vpop.permute.xlu2 %1761 }
 0x34d   : > { %v2008_v17 = vpack.c.bf16 %v4086_v48, %v4089_v49  ;;  %v4108_v52 = vmul.f32 %v1762_v27, %v3331_v2  ;;  %v4611_v49 = vld [vmem:[#allocation39_spill] sm:$0xff] }
 0x34f   : > { %v1657_v1 = vpop.f32.mrf.mxu3 }
 0x350   : > { %1855 = vrot.lane.b32.xlu1 %v1657_v1, %s3005_s26  ;;  %v1572_v23 = vpop.f32.mrf.mxu2 }
 0x352   : > { %v1828_v22 = vpop.permute.xlu1 %1827 }
 0x353   : > { %v4100_v32 = vmul.f32 %v1828_v22, %v3580_v13  ;;  %v4593_v22 = vld [vmem:[#allocation27_spill] sm:$0xff] }
 0x355   : > { %v2026_v30 = vpack.c.bf16 %v4097_v6, %v4100_v32 }
 0x357   : > { %v1659_v8 = vpop.f32.mrf.mxu3 }
 0x358   : > { %1857 = vrot.lane.b32.xlu2 %v1659_v8, %s3005_s26  ;;  %1785 = vrot.lane.b32.xlu1 %v1569_v41, %s3005_s26  ;;  %v1574_v29 = vpop.f32.mrf.mxu2 }
 0x359   : > { %1789 = vrot.lane.b32.xlu0 %v1574_v29, %s3005_s26 }
 0x35a   : > { %v1760_v21 = vpop.permute.xlu1 %1759  ;;  %v1836_v25 = vpop.permute.xlu2 %1835 }
 0x35b   : > { %v4111_v39 = vmul.f32 %v1760_v21, %v3327_v12  ;;  %v4134_v58 = vmul.f32 %v1836_v25, %v4591_v54  ;;  %v4594_v21 = vld [vmem:[#allocation24_spill] sm:$0xff] }
 0x35d   : > { %v2009_v13 = vpack.c.bf16 %v4108_v52, %v4111_v39 }
 0x35f   : > { %v1662_v28 = vpop.f32.mrf.mxu3 }
 0x360   : > { %1787 = vrot.lane.b32.xlu2 %v1572_v23, %s3005_s26  ;;  %1859 = vrot.lane.b32.xlu1 %v1662_v28, %s3005_s26  ;;  %v1577_v7 = vpop.f32.mrf.mxu2 }
 0x362   : > { %v1832_v33 = vpop.permute.xlu0 %1831  ;;  %v1766_v16 = vpop.permute.xlu2 %1765 }
 0x363   : > { %v4120_v12 = vmul.f32 %v1832_v33, %v4546_v3  ;;  %v1950_v53 = vmul.f32 %v1766_v16, %v4589_v35  ;;  %v4595_v16 = vld [vmem:[#allocation35_spill] sm:$0xff] }
 0x367   : > { %v1664_v44 = vpop.f32.mrf.mxu3 }
 0x368   : > { %1861 = vrot.lane.b32.xlu2 %v1664_v44, %s3005_s26  ;;  %v1579_v51 = vpop.f32.mrf.mxu2 }
 0x369   : > { %1793 = vrot.lane.b32.xlu0 %v1579_v51, %s3005_s26 }
 0x36a   : > { %v1834_v2 = vpop.permute.xlu1 %1833  ;;  %v1768_v37 = vpop.permute.xlu2 %1767 }
 0x36b   : > { %v4123_v15 = vmul.f32 %v1834_v2, %v4588_v11  ;;  %v1951_v28 = vmul.f32 %v1768_v37, %v4594_v21 }
 0x36d   : > { %v2027_v42 = vpack.c.bf16 %v4123_v15, %v4120_v12 }
 0x36f   : > { %v1667_v46 = vpop.f32.mrf.mxu3 }
 0x370   : > { %1863 = vrot.lane.b32.xlu1 %v1667_v46, %s3005_s26  ;;  %1791 = vrot.lane.b32.xlu2 %v1577_v7, %s3005_s26  ;;  %v1582_v20 = vpop.f32.mrf.mxu2 }
 0x372   : > { %v1764_v0 = vpop.permute.xlu1 %1763  ;;  %v1840_v29 = vpop.permute.xlu2 %1839 }
 0x373   : > { %v1949_v4 = vmul.f32 %v1764_v0, %v4590_v59  ;;  %v4596_v0 = vld [vmem:[#allocation47_spill] sm:$0xff]  ;;  %v4597_v59 = vld [vmem:[#allocation14_spill] sm:$0xff] }
 0x375   : > { %v2010_v3 = vpack.c.bf16 %v1950_v53, %v1949_v4 }
 0x377   : > { %v1669_v38 = vpop.f32.mrf.mxu3  ;;  %2077 = vrot.lane.b32.xlu0 %v2010_v3, %s3006_s27  ;;  %v4598_v3 = vld [vmem:[#allocation15_spill] sm:$0xff] }
 0x378   : > { %1865 = vrot.lane.b32.xlu2 %v1669_v38, %s3005_s26  ;;  %v1584_v43 = vpop.f32.mrf.mxu2 }
 0x37a   : > { %v1838_v50 = vpop.permute.xlu0 %1837  ;;  %v1844_v51 = vpop.permute.xlu2 %1843 }
 0x37b   : > { %v4137_v34 = vmul.f32 %v1838_v50, %v4592_v56  ;;  %v1989_v4 = vmul.f32 %v1844_v51, %v4597_v59  ;;  %v4604_v59 = vld [vmem:[#allocation50_spill] sm:$0xff] }
 0x37d   : > { %v2028_v57 = vpack.c.bf16 %v4137_v34, %v4134_v58  ;;  %v4609_v58 = vld [vmem:[#allocation34_spill] sm:$0xff] }
 0x37f   : > { %v1672_v9 = vpop.f32.mrf.mxu3 }
 0x380   : > { %1795 = vrot.lane.b32.xlu2 %v1582_v20, %s3005_s26  ;;  %1867 = vrot.lane.b32.xlu0 %v1672_v9, %s3005_s26  ;;  %v1587_v41 = vpop.f32.mrf.mxu2 }
 0x382   : > { %v1770_v5 = vpop.permute.xlu0 %1769 }
 0x383   : > { %v1952_v8 = vmul.f32 %v1770_v5, %v4593_v22 }
 0x385   : > { %v2011_v7 = vpack.c.bf16 %v1952_v8, %v1951_v28  ;;  %v4599_v8 = vld [vmem:[#allocation31_spill] sm:$0xff] }
 0x387   : > { %v1674_v1 = vpop.f32.mrf.mxu3 }
 0x388   : > { %1869 = vrot.lane.b32.xlu1 %v1674_v1, %s3005_s26  ;;  %1797 = vrot.lane.b32.xlu0 %v1584_v43, %s3005_s26  ;;  %v1589_v23 = vpop.f32.mrf.mxu2  ;;  %v1776_v43 = vpop.permute.xlu2 %1775 }
 0x389   : > { %1801 = vrot.lane.b32.xlu2 %v1589_v23, %s3005_s26 }
 0x38a   : > { %v1842_v27 = vpop.permute.xlu0 %1841 }
 0x38b   : > { %v1774_v11 = vpop.permute.xlu1 %1773 }
 0x38c   : > { %v1954_v35 = vmul.f32 %v1774_v11, %v4596_v0 }
 0x38f   : > { %v1677_v25 = vpop.f32.mrf.mxu3 }
 0x390   : > { %1799 = vrot.lane.b32.xlu1 %v1587_v41, %s3005_s26  ;;  %2079 = vrot.lane.b32.xlu0 %v2011_v7, %s3006_s27  ;;  %v1592_v44 = vpop.f32.mrf.mxu2  ;;  %v1778_v41 = vpop.permute.xlu2 %1777  ;;  %v4600_v7 = vld [vmem:[#allocation19_spill] sm:$0xff] }
 0x391   : > { %v1956_v21 = vmul.f32 %v1778_v41, %v4599_v8  ;;  %v4606_v41 = vld [vmem:[#allocation21_spill] sm:$0xff] }
 0x392   : > { %v1772_v33 = vpop.permute.xlu0 %1771 }
 0x393   : > { %v1953_v20 = vmul.f32 %v1772_v33, %v4595_v16  ;;  %v4601_v33 = vld [vmem:[#allocation18_spill] sm:$0xff] }
 0x395   : > { %v2012_v54 = vpack.c.bf16 %v1954_v35, %v1953_v20  ;;  %v4603_v35 = vld [vmem:[#allocation36_spill] sm:$0xff] }
 0x397   : > { %v1679_v2 = vpop.f32.mrf.mxu3 }
 0x398   : > { %1873 = vrot.lane.b32.xlu1 %v1679_v2, %s3005_s26  ;;  %1871 = vrot.lane.b32.xlu0 %v1677_v25, %s3005_s26  ;;  %v1594_v46 = vpop.f32.mrf.mxu2 }
 0x39a   : > { %v1846_v53 = vpop.permute.xlu0 %1845 }
 0x39b   : > { %v1990_v38 = vmul.f32 %v1846_v53, %v4598_v3 }
 0x39d   : > { %v2030_v50 = vpack.c.bf16 %v1990_v38, %v1989_v4 }
 0x39f   : > { %v1682_v56 = vpop.f32.mrf.mxu3  ;;  %2117 = vrot.lane.b32.xlu2 %v2030_v50, %s3006_s27 }
 0x3a0   : > { %2081 = vrot.lane.b32.xlu0 %v2012_v54, %s3006_s27  ;;  %1805 = vrot.lane.b32.xlu1 %v1594_v46, %s3005_s26  ;;  %v1597_v9 = vpop.f32.mrf.mxu2 }
 0x3a2   : > { %v1854_v23 = vpop.permute.xlu2 %1853 }
 0x3a3   : > { %v1780_v5 = vpop.permute.xlu1 %1779  ;;  %v4165_v25 = vmul.f32 %v1854_v23, %v4600_v7 }
 0x3a4   : > { %v1957_v53 = vmul.f32 %v1780_v5, %v4603_v35  ;;  %v4608_v5 = vld [vmem:[#allocation12_spill] sm:$0xff] }
 0x3a5   : > { %v1987_v23 = vmul.f32 %v1840_v29, %v4608_v5 }
 0x3a7   : > { %v1684_v37 = vpop.f32.mrf.mxu3 }
 0x3a8   : > { %1803 = vrot.lane.b32.xlu0 %v1592_v44, %s3005_s26  ;;  %1877 = vrot.lane.b32.xlu1 %v1684_v37, %s3005_s26  ;;  %v1599_v1 = vpop.f32.mrf.mxu2  ;;  %v4602_v44 = vld [vmem:[#allocation26_spill] sm:$0xff]  ;;  %v4607_v37 = vld [vmem:[#allocation20_spill] sm:$0xff] }
 0x3a9   : > { %v1955_v2 = vmul.f32 %v1776_v43, %v4602_v44  ;;  %v4605_v43 = vld [vmem:[#allocation13_spill] sm:$0xff] }
 0x3aa   : > { %v1988_v50 = vmul.f32 %v1842_v27, %v4605_v43 }
 0x3ab   : > { %v2013_v46 = vpack.c.bf16 %v1956_v21, %v1955_v2 }
 0x3ac   : > { %v2029_v21 = vpack.c.bf16 %v1988_v50, %v1987_v23  ;;  %v4617_v50 = vld [vmem:[#allocation42_spill] sm:$0xff] }
 0x3b0   : > { %1875 = vrot.lane.b32.xlu0 %v1682_v56, %s3005_s26  ;;  %1809 = vrot.lane.b32.xlu1 %v1599_v1, %s3005_s26  ;;  %v1602_v22 = vpop.f32.mrf.mxu2 }
 0x3b2   : > { %v1852_v28 = vpop.permute.xlu1 %1851  ;;  %v1858_v16 = vpop.permute.xlu2 %1857 }
 0x3b3   : > { %v4168_v51 = vmul.f32 %v1852_v28, %v4601_v33  ;;  %v1784_v7 = vpop.permute.xlu0 %1783 }
 0x3b5   : > { %v2032_v11 = vpack.c.bf16 %v4165_v25, %v4168_v51  ;;  %v2953_v51 = vld [vmem:[%s4399_s7] sm:$0xf] }
 0x3b8   : > { %2083 = vrot.lane.b32.xlu0 %v2013_v46, %s3006_s27  ;;  %1849 = vrot.lane.b32.xlu1 %v4061_v18, %s3005_s26  ;;  %v1604_v20 = vpop.f32.mrf.mxu2  ;;  %v4183_v18 = vmul.f32 %v1858_v16, %v4606_v41  ;;  %v4613_v16 = vld [vmem:[#allocation45_spill] sm:$0xff] }
 0x3b9   : > { %v4618_v41 = vld [vmem:[#allocation33_spill] sm:$0xff] }
 0x3ba   : > { %v1782_v0 = vpop.permute.xlu1 %1781  ;;  %v1788_v54 = vpop.permute.xlu2 %1787 }
 0x3bb   : > { %v1958_v4 = vmul.f32 %v1782_v0, %v4604_v59  ;;  %v4614_v0 = vld [vmem:[#allocation56_spill] sm:$0xff] }
 0x3bd   : > { %v2014_v3 = vpack.c.bf16 %v1958_v4, %v1957_v53 }
 0x3bf   : > { %2085 = vrot.lane.b32.xlu2 %v2014_v3, %s3006_s27 }
 0x3c0   : > { %1807 = vrot.lane.b32.xlu0 %v1597_v9, %s3005_s26  ;;  %1813 = vrot.lane.b32.xlu1 %v1604_v20, %s3005_s26  ;;  %v1607_v38 = vpop.f32.mrf.mxu2 }
 0x3c2   : > { %v1856_v56 = vpop.permute.xlu1 %1855  ;;  %v4197_v9 = vpop.permute.xlu2 %1861 }
 0x3c3   : > { %v4186_v1 = vmul.f32 %v1856_v56, %v4607_v37 }
 0x3c5   : > { %v2033_v8 = vpack.c.bf16 %v4183_v18, %v4186_v1 }
 0x3c7   : > { %2075 = vrot.lane.b32.xlu2 %v2009_v13, %s3006_s27 }
 0x3c8   : > { %1811 = vrot.lane.b32.xlu0 %v1602_v22, %s3005_s26  ;;  %2115 = vrot.lane.b32.xlu1 %v2029_v21, %s3006_s27  ;;  %v1609_v27 = vpop.f32.mrf.mxu2  ;;  %v4619_v21 = vld [vmem:[#allocation54_spill] sm:$0xff] }
 0x3ca   : > { %v1786_v28 = vpop.permute.xlu1 %1785  ;;  %v1792_v33 = vpop.permute.xlu2 %1791 }
 0x3cb   : > { %v1790_v52 = vpop.permute.xlu0 %1789 }
 0x3cf   : > { %1815 = vrot.lane.b32.xlu2 %v1607_v38, %s3005_s26  ;;  %v4616_v38 = vld [vmem:[#allocation32_spill] sm:$0xff] }
 0x3d0   : > { %1847 = vrot.lane.b32.xlu0 %v4057_v45, %s3005_s26  ;;  %v1612_v29 = vpop.f32.mrf.mxu2  ;;  %v1963_v43 = vmul.f32 %v1792_v33, %v4616_v38  ;;  %v4621_v33 = vld [vmem:[#allocation37_spill] sm:$0xff] }
 0x3d1   : > { %1819 = vrot.lane.b32.xlu1 %v1612_v29, %s3005_s26 }
 0x3d2   : > { %v1860_v39 = vpop.permute.xlu1 %1859  ;;  %v1866_v44 = vpop.permute.xlu2 %1865 }
 0x3d3   : > { %v4222_v34 = vmul.f32 %v1866_v44, %v4609_v58  ;;  %v1960_v58 = vmul.f32 %v1786_v28, %v4621_v33  ;;  %v4626_v28 = vld [vmem:[#allocation49_spill] sm:$0xff] }
 0x3d8   : > { %1817 = vrot.lane.b32.xlu0 %v1609_v27, %s3005_s26  ;;  %v1614_v13 = vpop.f32.mrf.mxu2  ;;  %v1962_v27 = vmul.f32 %v1790_v52, %v4619_v21  ;;  %v4623_v52 = vld [vmem:[#allocation22_spill] sm:$0xff] }
 0x3d9   : > { %2113 = vrot.lane.b32.xlu1 %v2028_v57, %s3006_s27  ;;  %1821 = vrot.lane.b32.xlu2 %v1614_v13, %s3005_s26  ;;  %v4610_v57 = vld [vmem:[#allocation29_spill] sm:$0xff] }
 0x3da   : > { %v1796_v48 = vpop.permute.xlu2 %1795 }
 0x3db   : > { %v1794_v22 = vpop.permute.xlu0 %1793 }
 0x3e0   : > { %2109 = vrot.lane.b32.xlu0 %v2026_v30, %s3006_s27 }
 0x3e1   : > { %2111 = vrot.lane.b32.xlu1 %v2027_v42, %s3006_s27  ;;  %2073 = vrot.lane.b32.xlu2 %v2008_v17, %s3006_s27  ;;  %v4612_v42 = vld [vmem:[#allocation46_spill] sm:$0xff] }
 0x3e2   : > { %v1864_v45 = vpop.permute.xlu1 %1863  ;;  %v1965_v46 = vmul.f32 %v1796_v48, %v4612_v42  ;;  %v1997_v42 = vmul.f32 %v1860_v39, %v4623_v52  ;;  %v4632_v52 = vld [vmem:[#allocation62_spill] sm:$0xff] }
 0x3e3   : > { %v4225_v2 = vmul.f32 %v1864_v45, %v4610_v57  ;;  %v1802_v26 = vpop.permute.xlu2 %1801 }
 0x3e4   : > { %v1968_v56 = vmul.f32 %v1802_v26, %v4617_v50 }
 0x3e5   : > { %v2035_v6 = vpack.c.bf16 %v4222_v34, %v4225_v2 }
 0x3e9   : > { %v4229_v32 = vpop.permute.xlu0 %2077  ;;  %2071 = vrot.lane.b32.xlu2 %v2007_v60, %s3006_s27  ;;  %v1964_v60 = vmul.f32 %v1794_v22, %v4615_v62  ;;  %v4620_v22 = vld [vmem:[#allocation43_spill] sm:$0xff] }
 0x3ea   : > { %v1961_v44 = vmul.f32 %v1788_v54, %v4620_v22  ;;  %v4624_v54 = vld [vmem:[#allocation25_spill] sm:$0xff] }
 0x3eb   : > { %v2017_v5 = vpack.c.bf16 %v1964_v60, %v1963_v43 }
 0x3ec   : > { %v2016_v45 = vpack.c.bf16 %v1962_v27, %v1961_v44 }
 0x3f2   : > { %v1868_v30 = vpop.permute.xlu0 %1867 }
 0x3f3   : > { %v4236_v17 = vmul.f32 %v1868_v30, %v4611_v49  ;;  %v4622_v49 = vld [vmem:[#allocation28_spill] sm:$0xff] }
 0x3f9   : > { %v2118_v57 = vpop.permute.xlu2 %2117 }
 0x3fa   : > { %v1870_v12 = vpop.permute.xlu1 %1869  ;;  %v1798_v15 = vpop.permute.xlu0 %1797 }
 0x3fb   : > { %v4240_v20 = vmul.f32 %v1870_v12, %v4613_v16  ;;  %v1966_v35 = vmul.f32 %v1798_v15, %v4614_v0  ;;  %v1959_v12 = vmul.f32 %v1784_v7, %v4622_v49 }
 0x3fd   : > { %v2036_v53 = vpack.c.bf16 %v4240_v20, %v4236_v17  ;;  %v2018_v59 = vpack.c.bf16 %v1966_v35, %v1965_v46  ;;  %v2015_v15 = vpack.c.bf16 %v1960_v58, %v1959_v12  ;;  %v1998_v35 = vmul.f32 %v4197_v9, %v4624_v54  ;;  %v4630_v58 = vld [vmem:[#allocation51_spill] sm:$0xff] }
 0x3ff   : > { %2093 = vrot.lane.b32.xlu2 %v2018_v59, %s3006_s27  ;;  %v4625_v59 = vld [vmem:[#allocation57_spill] sm:$0xff]  ;;  %v2034_v60 = vpack.c.bf16 %v1998_v35, %v1997_v42 }
 0x402   : > { %v1800_v4 = vpop.permute.xlu1 %1799  ;;  %v2080_v3 = vpop.permute.xlu0 %2079 }
 0x403   : > { %v1967_v37 = vmul.f32 %v1800_v4, %v4618_v41 }
 0x405   : > { %v2019_v23 = vpack.c.bf16 %v1968_v56, %v1967_v37  ;;  %v4627_v37 = vld [vmem:[#allocation44_spill] sm:$0xff] }
 0x407   : > { %2095 = vrot.lane.b32.xlu0 %v2019_v23, %s3006_s27  ;;  %2091 = vrot.lane.b32.xlu2 %v2017_v5, %s3006_s27  ;;  %v4628_v23 = vld [vmem:[#allocation38_spill] sm:$0xff] }
 0x40a   : > { %v4253_v29 = vpop.permute.xlu1 %1873  ;;  %v4255_v13 = vpop.permute.xlu0 %1871 }
 0x40f   : > { %2089 = vrot.lane.b32.xlu2 %v2016_v45, %s3006_s27  ;;  %v4629_v45 = vld [vmem:[#allocation58_spill] sm:$0xff] }
 0x412   : > { %v2082_v30 = vpop.permute.xlu0 %2081  ;;  %v1806_v48 = vpop.permute.xlu1 %1805 }
 0x413   : > { %v1970_v26 = vmul.f32 %v1806_v48, %v4625_v59  ;;  %v4633_v59 = vld [vmem:[#allocation60_spill] sm:$0xff] }
 0x417   : > { %2087 = vrot.lane.b32.xlu2 %v2015_v15, %s3006_s27 }
 0x419   : > { %v2086_v46 = vpop.permute.xlu2 %2085 }
 0x41a   : > { %2167 = vmatpush.bf16.msra.mxu3 %v2086_v46  ;;  %v1804_v16 = vpop.permute.xlu0 %1803  ;;  %v1878_v0 = vpop.permute.xlu1 %1877 }
 0x41b   : > { %v1969_v62 = vmul.f32 %v1804_v16, %v4626_v28  ;;  %v2006_v42 = vmul.f32 %v1878_v0, %v4632_v52  ;;  %v4634_v28 = vld [vmem:[#allocation55_spill] sm:$0xff]  ;;  %v4637_v0 = vld [vmem:[#allocation52_spill] sm:$0xff] }
 0x41d   : > { %v2020_v4 = vpack.c.bf16 %v1970_v26, %v1969_v62 }
 0x41f   : > { %2097 = vrot.lane.b32.xlu0 %v2020_v4, %s3006_s27  ;;  %2125 = vrot.lane.b32.xlu2 %v2034_v60, %s3006_s27  ;;  %v2003_v60 = vmul.f32 %v4255_v13, %v4637_v0 }
 0x421   : > { %v2076_v7 = vpop.permute.xlu2 %2075 }
 0x422   : > { %v1876_v38 = vpop.permute.xlu0 %1875  ;;  %v1810_v39 = vpop.permute.xlu1 %1809 }
 0x423   : > { %v1972_v5 = vmul.f32 %v1810_v39, %v4627_v37 }
 0x429   : > { %v1816_v56 = vpop.permute.xlu2 %1815 }
 0x42a   : > { %v2084_v43 = vpop.permute.xlu0 %2083  ;;  %v1850_v50 = vpop.permute.xlu1 %1849 }
 0x42b   : > { %2168 = vmatpush.bf16.msra.mxu3 %v2084_v43  ;;  %v1992_v46 = vmul.f32 %v1850_v50, %v4578_v47  ;;  %v4640_v50 = vld [vmem:[#allocation41_spill] sm:$0xff] }
 0x42f   : > { %2169 = vmatpush.bf16.msra.mxu3 %v2082_v30 }
 0x432   : > { %v1808_v41 = vpop.permute.xlu0 %1807  ;;  %v1814_v9 = vpop.permute.xlu1 %1813 }
 0x433   : > { %v1971_v21 = vmul.f32 %v1808_v41, %v4628_v23  ;;  %2170 = vmatpush.bf16.msra.mxu3 %v2080_v3  ;;  %v1822_v27 = vpop.permute.xlu2 %1821  ;;  %v1974_v33 = vmul.f32 %v1814_v9, %v4629_v45  ;;  %v1975_v41 = vmul.f32 %v1816_v56, %v4640_v50 }
 0x434   : > { %v1978_v26 = vmul.f32 %v1822_v27, %v4633_v59 }
 0x435   : > { %v2021_v22 = vpack.c.bf16 %v1972_v5, %v1971_v21 }
 0x437   : > { %2171 = vmatpush.bf16.msra.mxu3 %v4229_v32  ;;  %2099 = vrot.lane.b32.xlu0 %v2021_v22, %s3006_s27  ;;  %v4631_v32 = vld [vmem:[#allocation61_spill] sm:$0xff] }
 0x438   : > { %v2005_v3 = vmul.f32 %v1876_v38, %v4631_v32  ;;  %v4639_v38 = vld [vmem:[#allocation48_spill] sm:$0xff] }
 0x43a   : > { %v1812_v44 = vpop.permute.xlu0 %1811  ;;  %v2116_v49 = vpop.permute.xlu1 %2115  ;;  %v2038_v14 = vpack.c.bf16 %v2006_v42, %v2005_v3 }
 0x43b   : > { %v1973_v48 = vmul.f32 %v1812_v44, %v4630_v58  ;;  %2172 = vmatpush.bf16.msra.mxu3 %v2076_v7  ;;  %v2074_v30 = vpop.permute.xlu2 %2073 }
 0x43d   : > { %v2022_v12 = vpack.c.bf16 %v1974_v33, %v1973_v48 }
 0x43f   : > { %2107 = vrot.lane.b32.xlu0 %v2025_v31, %s3006_s27  ;;  %2101 = vrot.lane.b32.xlu1 %v2022_v12, %s3006_s27 }
 0x440   : > { %2173 = vmatpush.bf16.msra.mxu3 %v2074_v30 }
 0x442   : > { %v1848_v15 = vpop.permute.xlu0 %1847 }
 0x443   : > { %v1991_v16 = vmul.f32 %v1848_v15, %v4577_v63  ;;  %v1820_v54 = vpop.permute.xlu1 %1819  ;;  %v2072_v35 = vpop.permute.xlu2 %2071  ;;  %v2249_v15 = vld [vmem:[#allocation4] sm:$0xff] }
 0x444   : > { %v1977_v62 = vmul.f32 %v1820_v54, %v4634_v28  ;;  %2174 = vmatpush.bf16.msra.mxu3 %v2072_v35 }
 0x445   : > { %v2031_v10 = vpack.c.bf16 %v1992_v46, %v1991_v16 }
 0x446   : > { %v2024_v31 = vpack.c.bf16 %v1978_v26, %v1977_v62 }
 0x447   : > { %2133 = vrot.lane.b32.xlu1 %v2038_v14, %s3006_s27  ;;  %2119 = vrot.lane.b32.xlu2 %v2031_v10, %s3006_s27 }
 0x448   : > { %2195 = vmatpush.bf16.msrb.mxu3 %v2118_v57  ;;  %2105 = vrot.lane.b32.xlu0 %v2024_v31, %s3006_s27  ;;  %v4638_v57 = vld [vmem:[#allocation59_spill] sm:$0xff] }
 0x449   : > { %2721 = vmatmul.msk.bf16.vlgmr.msra.gmra.mxu3 %vm2680_vm10, %v4573_v19  ;;  %v2004_v7 = vmul.f32 %v4253_v29, %v4638_v57 }
 0x44a   : > { %v1818_v4 = vpop.permute.xlu0 %1817 }
 0x44b   : > { %v1976_v39 = vmul.f32 %v1818_v4, %v4639_v38  ;;  %v2114_v43 = vpop.permute.xlu1 %2113  ;;  %v2037_v9 = vpack.c.bf16 %v2004_v7, %v2003_v60 }
 0x44c   : > { %2196 = vmatpush.bf16.msrb.mxu3 %v2116_v49 }
 0x44d   : > { %v2023_v37 = vpack.c.bf16 %v1976_v39, %v1975_v41 }
 0x44f   : > { %2131 = vrot.lane.b32.xlu1 %v2037_v9, %s3006_s27 }
 0x450   : > { %2197 = vmatpush.bf16.msrb.mxu3 %v2114_v43  ;;  %2103 = vrot.lane.b32.xlu0 %v2023_v37, %s3006_s27 }
 0x452   : > { %v2110_v13 = vpop.permute.xlu0 %2109 }
 0x453   : > { %v2112_v5 = vpop.permute.xlu1 %2111 }
 0x454   : > { %2198 = vmatpush.bf16.msrb.mxu3 %v2112_v5 }
 0x457   : > { %2129 = vrot.lane.b32.xlu1 %v2036_v53, %s3006_s27 }
 0x458   : > { %2123 = vrot.lane.b32.xlu0 %v2033_v8, %s3006_s27  ;;  %2199 = vmatpush.bf16.msrb.mxu3 %v2110_v13 }
 0x459   : > { %v2094_v20 = vpop.permute.xlu2 %2093 }
 0x45f   : > { %2127 = vrot.lane.b32.xlu1 %v2035_v6, %s3006_s27 }
 0x461   : > { %v2092_v18 = vpop.permute.xlu2 %2091 }
 0x467   : > { %2121 = vrot.lane.b32.xlu1 %v2032_v11, %s3006_s27 }
 0x469   : > { %v2090_v25 = vpop.permute.xlu2 %2089 }
 0x471   : > { %v2088_v2 = vpop.permute.xlu2 %2087 }
 0x479   : > { %v2096_v29 = vpop.permute.xlu0 %2095  ;;  %v2126_v36 = vpop.permute.xlu2 %2125 }
 0x491   : > { %v2098_v56 = vpop.permute.xlu0 %2097 }
 0x4a1   : > { %v2120_v45 = vpop.permute.xlu2 %2119 }
 0x4a9   : > { %v2100_v17 = vpop.permute.xlu0 %2099 }
 0x4b1   : > { %v2108_v53 = vpop.permute.xlu0 %2107  ;;  %v2102_v23 = vpop.permute.xlu1 %2101 }
 0x4b2   : > { %2181 = vmatpush.bf16.msrb.mxu1 %v2102_v23  ;;  %2200 = vmatpush.bf16.msrb.mxu3 %v2108_v53 }
 0x4b6   : > { %2182 = vmatpush.bf16.msrb.mxu1 %v2100_v17 }
 0x4b9   : > { %v2134_v8 = vpop.permute.xlu1 %2133 }
 0x4ba   : > { %2183 = vmatpush.bf16.msrb.mxu1 %v2098_v56  ;;  %v2106_v1 = vpop.permute.xlu0 %2105 }
 0x4bb   : > { %2201 = vmatpush.bf16.msrb.mxu3 %v2106_v1 }
 0x4be   : > { %2184 = vmatpush.bf16.msrb.mxu1 %v2096_v29 }
 0x4c1   : > { %v2132_v11 = vpop.permute.xlu1 %2131 }
 0x4c2   : > { %2185 = vmatpush.bf16.msrb.mxu1 %v2094_v20  ;;  %v2104_v34 = vpop.permute.xlu0 %2103 }
 0x4c3   : > { %2202 = vmatpush.bf16.msrb.mxu3 %v2104_v34 }
 0x4c6   : > { %2186 = vmatpush.bf16.msrb.mxu1 %v2092_v18  ;;  %2725 = vmatmul.msk.bf16.vlgmr.msrb.gmra.mxu3 %vm2684_vm1, %v4573_v19 }
 0x4c7   : > { %2728 = vmatpush.msk.msra.mxu3 %vm2225_vm8, %v2953_v51 }
 0x4c9   : > { %v2130_v6 = vpop.permute.xlu1 %2129 }
 0x4ca   : > { %2187 = vmatpush.bf16.msrb.mxu1 %v2090_v25  ;;  %v2124_v22 = vpop.permute.xlu0 %2123 }
 0x4cc   : > { %v2176_v33 = vpop.f32.mrf.mxu3 }
 0x4ce   : > { %2188 = vmatpush.bf16.msrb.mxu1 %v2088_v2 }
 0x4d1   : > { %2723 = vmatmul.msk.bf16.vlgmr.msrb.gmra.mxu1 %vm2682_vm14, %v4573_v19  ;;  %v2128_v61 = vpop.permute.xlu1 %2127 }
 0x4d2   : > { %2209 = vmatpush.bf16.msra.mxu1 %v2134_v8 }
 0x4d6   : > { %2210 = vmatpush.bf16.msra.mxu1 %v2132_v11  ;;  %2729 = vmatmul.msk.f32.vlgmr.msra.gmra.mxu3 %vm949_vm6, %v4004_v24  ;;  %v2178_v24 = vpop.f32.mrf.mxu3 }
 0x4d9   : > { %v2122_v44 = vpop.permute.xlu1 %2121 }
 0x4da   : > { %2211 = vmatpush.bf16.msra.mxu1 %v2130_v6 }
 0x4de   : > { %2212 = vmatpush.bf16.msra.mxu1 %v2128_v61 }
 0x4e2   : > { %2213 = vmatpush.bf16.msra.mxu1 %v2126_v36 }
 0x4e6   : > { %2214 = vmatpush.bf16.msra.mxu1 %v2124_v22 }
 0x4ea   : > { %2215 = vmatpush.bf16.msra.mxu1 %v2122_v44 }
 0x4ee   : > { %2216 = vmatpush.bf16.msra.mxu1 %v2120_v45 }
 0x4f1   : > { %2727 = vmatmul.msk.bf16.vlgmr.msra.gmra.mxu1 %vm2686_vm4, %v4573_v19 }
 0x549   : > { %v2204_v58 = vpop.f32.mrf.mxu3 }
 0x54e   : > { %v2190_v48 = vpop.f32.mrf.mxu1 }
 0x54f   : > { %v2191_v32 = vadd.f32 %v2190_v48, %v2176_v33 }
 0x551   : > { %v2206_v49 = vpop.f32.mrf.mxu3  ;;  %v2205_v52 = vadd.f32 %v2204_v58, %v2191_v32 }
 0x556   : > { %v2192_v30 = vpop.f32.mrf.mxu1 }
 0x557   : > { %v2193_v54 = vadd.f32 %v2192_v30, %v2178_v24 }
 0x559   : > { %v2246_v12 = vpop.f32.mrf.mxu3  ;;  %v2207_v19 = vadd.f32 %v2206_v49, %v2193_v54 }
 0x55a   : > { %v2251_v3 = vperm.slane %v2246_v12, 0 }
 0x55c   : > { %v2252_v46 = vmul.f32 %v2251_v3, %v2249_v15  ;;  %v2253_v59 = vmul.f32 %v2251_v3, %v2250_v55 }
 0x56e   : > { %v2218_v42 = vpop.f32.mrf.mxu1 }
 0x56f   : > { %v2219_v16 = vadd.f32 %v2218_v42, %v2205_v52 }
 0x571   : > { %v2254_v40 = vadd.f32 %v2252_v46, %v2219_v16 }
 0x573   : > { %2256 = vst.msk [vmem:[#allocation4] sm:$0xff] %vm682_vm5, %v2254_v40 }
 0x576   : > { %v2220_v35 = vpop.f32.mrf.mxu1 }
 0x577   : > { %v2221_v26 = vadd.f32 %v2220_v35, %v2207_v19  ;;  %2264 = sbr.rel (%p2730_p6) target bundleno = 1985 (0x7c1), region = 76 }
 0x579   : > { %v2255_v28 = vadd.f32 %v2253_v59, %v2221_v26 }
 0x57b   : > { %2258 = vst.msk [vmem:[#allocation4 + $0x8] sm:$0x3] %vm2257_vm9, %v2255_v28 }
 0x57c   : > { %v4643_v62 = vld [vmem:[#allocation63_spill] sm:$0xff]  ;;  %v2265_v14 = vld [vmem:[#allocation3] sm:$0xff]  ;;  %v2271_v7 = vld [vmem:[#allocation4] sm:$0xff] }
 0x57d   : > { %2731 = vmatpush.msk.msra.mxu0 %vm2225_vm8, %v4643_v62  ;;  %v2267_v10 = vmax.f32 %v2265_v14, 1e-30  ;;  %v2266_v31 = vld [vmem:[#allocation3 + $0x8] sm:$0x3]  ;;  %v2793_v4 = vld [vmem:[%s4397_s5] sm:$0xff] }
 0x57e   : > { %v2268_v47 = vmax.f32 %v2266_v31, 1e-30  ;;  %v2794_v60 = vld [vmem:[%s4397_s5 + $0x8] sm:$0xff]  ;;  %v2954_v43 = vld [vmem:[%s4394_s2] ss:$0 sm:$0xff] }
 0x57f   : > { %2958 = vrcp.f32 %v2267_v10  ;;  %2340 = vmatpush.bf16.msra.mxu1 %v2794_v60  ;;  %v2796_v13 = vld [vmem:[%s4401_s9 + $0x8] sm:$0xff]  ;;  %v2795_v29 = vld [vmem:[%s4401_s9] sm:$0xff] }
 0x580   : > { %2960 = vrcp.f32 %v2268_v47  ;;  %2380 = vmatpush.bf16.msra.mxu2 %v2796_v13  ;;  %v2955_v17 = vld [vmem:[%s4398_s6] ss:$0 sm:$0xff]  ;;  %v2353_v6 = vld [vmem:[%s4400_s8 + $0x8] sm:$0x3] }
 0x581   : > { %v2352_v2 = vld [vmem:[%s4400_s8] sm:$0xff] }
 0x582   : > { %v2272_v38 = vld [vmem:[#allocation4 + $0x8] sm:$0x3]  ;;  %v2956_v21 = vld [vmem:[%s4402_s10] ss:$0 sm:$0xff] }
 0x583   : > { %2341 = vmatpush.bf16.msra.mxu1 %v2793_v4  ;;  %v2957_v27 = vld [vmem:[%s4403_s11] ss:$0 sm:$0xff] }
 0x584   : > { %2381 = vmatpush.bf16.msra.mxu2 %v2795_v29 }
 0x585   : > { %v2959_v63 = vpop.eup %2958 }
 0x586   : > { %2732 = vmatmul.msk.f32.vlgmr.msra.gmra.mxu0 %vm949_vm6, %v2959_v63  ;;  %v2961_v0 = vpop.eup %2960 }
 0x58e   : > { %2733 = vmatmul.msk.f32.gmra.mxu0 %vm949_vm6, %v2961_v0  ;;  %vm2392_vm6 = vcmask 80896  }
 0x603   : > { %v2296_v57 = vpop.f32.mrf.mxu0 }
 0x604   : > { %v2302_v39 = vmul.f32 %v2296_v57, %v2271_v7 }
 0x606   : > { %v2308_v9 = vadd.f32 %v2954_v43, %v2302_v39 }
 0x60b   : > { %v2299_v50 = vpop.f32.mrf.mxu0 }
 0x60c   : > { %v2303_v41 = vmul.f32 %v2299_v50, %v2272_v38 }
 0x60e   : > { %v2309_v37 = vadd.f32 %v2954_v43, %v2303_v41 }
 0x610   : > { %v2310_v5 = vpack.c.bf16 %v2309_v37, %v2308_v9 }
 0x612   : > { %2742 = vmatmul.msk.bf16.vlgmr.msra.gmra.mxu1 %vm682_vm5, %v2310_v5 }
 0x68f   : > { %v2343_v56 = vpop.f32.mrf.mxu1 }
 0x690   : > { %v2344_v20 = vadd.f32 %v2955_v17, %v2343_v56 }
 0x692   : > { %v2348_v23 = vmax.f32 %v2344_v20, 0.0 }
 0x694   : > { %v2350_v8 = vadd.f32 %v2348_v23, %v2308_v9 }
 0x697   : > { %v2345_v53 = vpop.f32.mrf.mxu1 }
 0x698   : > { %v2346_v18 = vadd.f32 %v2955_v17, %v2345_v53 }
 0x69a   : > { %v2349_v1 = vmax.f32 %v2346_v18, 0.0 }
 0x69c   : > { %v2351_v34 = vadd.f32 %v2349_v1, %v2309_v37 }
 0x69e   : > { %v2354_v25 = vpack.c.bf16 %v2351_v34, %v2350_v8 }
 0x6a0   : > { %2751 = vmatmul.msk.bf16.vlgmr.msra.gmra.mxu2 %vm682_vm5, %v2354_v25 }
 0x723   : > { %v2383_v51 = vpop.f32.mrf.mxu2 }
 0x72b   : > { %v2385_v11 = vpop.f32.mrf.mxu2 }
 0x72c   : > { %2752 = vmatpush.msk.msra.mxu3 %vm1514_vm11, %v2385_v11 }
 0x72e   : > { %2417 = vmatpush.msra.mxu3 %v2383_v51 }
 0x72f   : > { %2753 = vmatmul.msk.f32.vlgmr.msra.gmra.mxu3 %vm2392_vm6, %v2352_v2 }
 0x737   : > { %2754 = vmatmul.msk.f32.gmra.mxu3 %vm2392_vm6, %v2353_v6 }
 0x7b2   : > { %v2419_v61 = vpop.f32.mrf.mxu3 }
 0x7b3   : > { %v2420_v36 = vadd.f32 %v2956_v21, %v2419_v61 }
 0x7b5   : > { %vm2426_vm10 = vcmp.gt.f32.partialorder %v2420_v36, 0.0  ;;  %v2431_v22 = vmul.f32 %v2957_v27, %v2420_v36 }
 0x7b7   : > { %v2433_v44 = vsel %vm2426_vm10, %v2420_v36, %v2431_v22 }
 0x7b8   : > { %2435 = vst.msk [vmem:[#allocation5] sm:$0xff] %vm682_vm5, %v2433_v44 }
 0x7ba   : > { %v2422_v45 = vpop.f32.mrf.mxu3 }
 0x7bb   : > { %v2423_v33 = vadd.f32 %v2956_v21, %v2422_v45 }
 0x7bd   : > { %vm2427_vm11 = vcmp.gt.f32.partialorder %v2423_v33, 0.0  ;;  %v2432_v24 = vmul.f32 %v2957_v27, %v2423_v33 }
 0x7bf   : > { %v2434_v58 = vsel %vm2427_vm11, %v2423_v33, %v2432_v24 }
 0x7c0   : > { %2436 = vst.msk [vmem:[#allocation5 + $0x8] sm:$0x3] %vm2257_vm9, %v2434_v58 }
 0x7c1 PF: > { %p2804_p7 = scmp.eq.s32.totalorder %s3081_s22, 2  ;;  %s3007_s16 = smov [#allocation5]  }
 0x7c2   : > { %s2442_s17 = sshll.u32 %s3007_s16, 4  ;;  %s2444_s20 = sshll.u32 %s4404_s12, 4  ;;  %s2443_s17 = int_to_ptr.vmem [resolvable:$true] %s2442_s17  ;;  %s2445_s20 = int_to_ptr.hbm [resolvable:$true] %s2444_s20 }
 0x7c3   : > { %s3008_s23 = smov 128   ;;  %s3009_s24 = smov 8  }
 0x7c4   : > { %2801 = dma.vmem_to_hbm [thread:$0]  (%p2804_p7), %s2443_s17, 256, %s2445_s20, [#allocation6], %s3008_s23, %s3008_s23, %s3009_s24  }
 0x7c5   : > { %2995 = dma.done.wait (%p2804_p7), [#allocation6], 256  }
 0x7c6   : > { %2997 = vsyncadd (%p2804_p7), [#allocation6], 4294967040 }
 0x7c7 PF: > { %s23_s21 = sadd.s32 1, %s3000_s21  }
 0x7c8   : > { %p20_p8 = scmp.ge.s32.totalorder %s23_s21, 5  }
 0x7ca   :  { %22 = sbr.rel (!%p20_p8) target bundleno = 1 (0x1), region = 106 }
 0x7cf   :  { %2461 = vsyncpa [#allocation6], 1 }
 0x7d0   :  { %2463 = vsyncpa [#allocation6 + $0x1], 1 }

</bundles_post_ra>
